<compile_context>
chip_gen: v7x
topology: tpu7x:2x2x1
jax: 0.10.0
libtpu: 0.0.40
codegen_flags: <defaults>
</compile_context>

<pallas_src>
import functools

import jax
import jax.numpy as jnp
import numpy as np
from jax.experimental import pallas as pl
from jax.experimental.pallas import tpu as pltpu

LANE = 128


def _round_up(n, m=LANE):
    return ((n + m - 1) // m) * m


# ------------------------------ fused kernel --------------------------------
def _qnet_kernel(p_ref, w1c_ref, b1c_ref, w2c_ref, b2c_ref,
                 fw1_ref, fb1_ref, fw2_ref, fb2_ref, fw3_ref, fb3_ref,
                 o_ref, flat_ref, *, C, B, S2P):
    """Whole forward pass for the full batch in one invocation.

    p_ref   : (9*C, 9*B*S2P) bf16  im2col: [tap k2 | batch b | padded spatial s]
    w1c_ref : (C, 9*C)       bf16  conv1 weights, inner order (di, dj, cin)
    b1c_ref : (C, 1)         f32
    w2c_ref : (9, C, C)      bf16  conv2 weights per tap
    b2c_ref : (C, 1)         f32
    fw*/fb* : MLP weights (bf16) / biases (f32), zero-padded to 128-lane widths
    o_ref   : (B, 128)       f32   padded Q-values (sliced to (B, A) outside)
    flat_ref: (B, C*S2P)     f32   scratch for the channel-major flatten
    """
    n2 = B * S2P

    # ---- conv1 (+bias+ReLU) for all 9 conv2 taps in ONE MXU matmul ----
    h1 = jnp.dot(w1c_ref[...], p_ref[...],
                 preferred_element_type=jnp.float32)            # (C, 9*n2)
    h1 = jnp.maximum(h1 + jnp.broadcast_to(b1c_ref[...], (C, 9 * n2)), 0.0)
    h1 = h1.astype(jnp.bfloat16)                                 # native MXU input

    # ---- conv2: 9 accumulating (C,C) dots on 128-lane-aligned slices ----
    # (v5e option: sublane-restack h1 into (9C, n2) and do one dot; skipped —
    #  on v6e/v7x the accumulating form is already cheap.)
    acc = jnp.zeros((C, n2), jnp.float32)
    for k2 in range(9):                                          # unrolled taps
        acc = acc + jnp.dot(w2c_ref[k2], h1[:, k2 * n2:(k2 + 1) * n2],
                            preferred_element_type=jnp.float32)
    out2 = jnp.maximum(acc + jnp.broadcast_to(b2c_ref[...], (C, n2)), 0.0)

    # ---- torch-style channel-major flatten via lane-aligned scratch copies ----
    # every copy is (1, S2P) at a multiple-of-128 lane offset -> unmasked stores.
    for c in range(C):
        for b in range(B):
            flat_ref[b:b + 1, c * S2P:(c + 1) * S2P] = \
                out2[c:c + 1, b * S2P:(b + 1) * S2P]
    flat = flat_ref[...].astype(jnp.bfloat16)                    # (B, C*S2P)

    # ---- MLP: three lane-dense bf16 matmuls with fused f32 bias + ReLU ----
    h = jnp.maximum(jnp.dot(flat, fw1_ref[...], preferred_element_type=jnp.float32)
                    + fb1_ref[...], 0.0).astype(jnp.bfloat16)
    h = jnp.maximum(jnp.dot(h, fw2_ref[...], preferred_element_type=jnp.float32)
                    + fb2_ref[...], 0.0).astype(jnp.bfloat16)
    o_ref[...] = jnp.dot(h, fw3_ref[...],
                         preferred_element_type=jnp.float32) + fb3_ref[...]


# --------------------------- wrapper-side layout -----------------------------
def _conv_w_rows(w):   # (O, I, 3, 3) -> (O, 9*I), inner order (di, dj, cin)
    o, i = w.shape[0], w.shape[1]
    return jnp.transpose(w, (0, 2, 3, 1)).reshape(o, 9 * i)


def _conv_w_taps(w):   # (O, I, 3, 3) -> (9, O, I), tap k = di*3 + dj
    o, i = w.shape[0], w.shape[1]
    return jnp.transpose(w, (2, 3, 0, 1)).reshape(9, o, i)


def _pad2(a, rows, cols):
    return jnp.pad(a, ((0, rows - a.shape[0]), (0, cols - a.shape[1])))


def _pad_bias(b, cols):
    return jnp.pad(b, (0, cols - b.shape[0]))[None, :]


def _build_patches(x, H2, W2, S2P):
    """x (B,C,H,W) -> P (9*C, 9*B*S2P) with
       P[k1*C + i, k2*B*S2P + b*S2P + h*W2 + w] = x[b, i, h+d2i+d1i, w+d2j+d1j];
       lanes with s >= H2*W2 are zero (masked by zero fw1 rows downstream)."""
    B, C = x.shape[0], x.shape[1]
    S2 = H2 * W2
    taps = []
    for k2 in range(9):
        d2i, d2j = divmod(k2, 3)
        rows = []
        for k1 in range(9):
            d1i, d1j = divmod(k1, 3)
            sl = x[:, :, d2i + d1i:d2i + d1i + H2, d2j + d1j:d2j + d1j + W2]
            r = jnp.transpose(sl, (1, 0, 2, 3)).reshape(C, B, S2)
            r = jnp.pad(r, ((0, 0), (0, 0), (0, S2P - S2))).reshape(C, B * S2P)
            rows.append(r)
        taps.append(jnp.concatenate(rows, axis=0))       # (9C, B*S2P)
    return jnp.concatenate(taps, axis=1)                 # (9C, 9*B*S2P)


# ------------------------------ forward -------------------------------------
def qnetwork_forward(x, params):
    assert x.ndim >= 3, "only support magent input observation"
    if x.ndim == 3:                      # CHW -> 1CHW (batchsize = 1 path)
        x = x[None]
    B, C, H, W = x.shape
    cw1, cw2 = params["cw1"], params["cw2"]
    # QNetwork uses Conv2d(C, C, 3) twice; the fused kernel relies on Cout == Cin == C.
    assert cw1.shape == (C, C, 3, 3) and cw2.shape == (C, C, 3, 3), \
        "fused kernel assumes Cout == Cin == C for both conv layers"
    H2, W2 = H - 4, W - 4
    S2 = H2 * W2
    S2P = _round_up(S2)                                   # 144 -> 256 (lane-aligned)
    A = params["w3"].shape[1]
    A_pad = _round_up(A)
    h1p = _round_up(params["w1"].shape[1])                # 120 -> 128
    h2p = _round_up(params["w2"].shape[1])                # 84  -> 128

    # layout plumbing (plain JAX): im2col + 2-D weight layouts + 128-lane padding;
    # big matmul operands cast to bf16 (dots accumulate in f32 inside the kernel).
    patches = _build_patches(x, H2, W2, S2P).astype(jnp.bfloat16)   # (9C, 9*B*S2P)
    w1c = _conv_w_rows(cw1).astype(jnp.bfloat16)                    # (C, 9C)
    w2c = _conv_w_taps(cw2).astype(jnp.bfloat16)                    # (9, C, C)
    b1c = params["cb1"][:, None]                                    # (C, 1) f32
    b2c = params["cb2"][:, None]                                    # (C, 1) f32

    # fc1 rows re-indexed to the padded per-(channel,batch) stride S2P; pad rows = 0.
    w1 = params["w1"].reshape(C, S2, -1)
    w1 = jnp.pad(w1, ((0, 0), (0, S2P - S2), (0, h1p - w1.shape[-1])))
    fw1 = w1.reshape(C * S2P, h1p).astype(jnp.bfloat16)             # (C*S2P, 128)
    fb1 = _pad_bias(params["b1"], h1p)                              # (1, 128) f32
    fw2 = _pad2(params["w2"], h1p, h2p).astype(jnp.bfloat16)        # (128, 128)
    fb2 = _pad_bias(params["b2"], h2p)
    fw3 = _pad2(params["w3"], h2p, A_pad).astype(jnp.bfloat16)      # (128, 128)
    fb3 = _pad_bias(params["b3"], A_pad)

    vmem = pl.BlockSpec(memory_space=pltpu.MemorySpace.VMEM)
    kern = functools.partial(_qnet_kernel, C=C, B=B, S2P=S2P)
    out = pl.pallas_call(
        kern,
        out_shape=jax.ShapeDtypeStruct((B, A_pad), jnp.float32),
        in_specs=[vmem] * 11,
        out_specs=vmem,
        scratch_shapes=[pltpu.VMEM((B, C * S2P), jnp.float32)],
    )(patches, w1c, b1c, w2c, b2c, fw1, fb1, fw2, fb2, fw3, fb3)
    return out[:, :A]


# --------------------------- params & reference ------------------------------
def init_params(key, obs_shape, action_shape):
    H, W, C = obs_shape
    flat_dim = C * (H - 4) * (W - 4)
    keys = jax.random.split(key, 10)

    def uinit(k, shape, fan_in):
        bound = 1.0 / np.sqrt(fan_in)
        return jax.random.uniform(k, shape, jnp.float32, -bound, bound)

    return {
        "cw1": uinit(keys[0], (C, C, 3, 3), C * 9),
        "cb1": uinit(keys[1], (C,), C * 9),
        "cw2": uinit(keys[2], (C, C, 3, 3), C * 9),
        "cb2": uinit(keys[3], (C,), C * 9),
        "w1": uinit(keys[4], (flat_dim, 120), flat_dim),
        "b1": uinit(keys[5], (120,), flat_dim),
        "w2": uinit(keys[6], (120, 84), 120),
        "b2": uinit(keys[7], (84,), 120),
        "w3": uinit(keys[8], (84, action_shape), 84),
        "b3": uinit(keys[9], (action_shape,), 84),
    }


def reference_forward(x, params):
    if x.ndim == 3:
        x = x[None]

    def conv(h, w, b):
        y = jax.lax.conv_general_dilated(
            h, w, (1, 1), "VALID", dimension_numbers=("NCHW", "OIHW", "NCHW"))
        return jnp.maximum(y + b[None, :, None, None], 0.0)

    h = conv(x, params["cw1"], params["cb1"])
    h = conv(h, params["cw2"], params["cb2"])
    h = h.reshape(h.shape[0], -1)
    h = jnp.maximum(h @ params["w1"] + params["b1"], 0.0)
    h = jnp.maximum(h @ params["w2"] + params["b2"], 0.0)
    return h @ params["w3"] + params["b3"]


if __name__ == "__main__":
    obs_shape = (16, 16, 4)      # (H, W, C) magent-style observation
    action_shape = 6
    B = 2

    key = jax.random.PRNGKey(0)
    pkey, xkey = jax.random.split(key)
    params = init_params(pkey, obs_shape, action_shape)
    # forward input is NCHW, like the torch module's forward
    x = jax.random.normal(xkey, (B, obs_shape[2], obs_shape[0], obs_shape[1]), jnp.float32)

    fwd = jax.jit(qnetwork_forward)
    out = jax.block_until_ready(fwd(x, params))

    ref = reference_forward(x, params)
    # bf16 matmul operands (f32 accumulation) -> slightly looser tolerance than pure f32
    np.testing.assert_allclose(np.asarray(out), np.asarray(ref), rtol=2e-2, atol=2e-2)
    assert out.shape == (B, action_shape)
    print("KERNEL_OK")
</pallas_src>

<mosaic_0001>
module attributes {stable_mosaic.version = 11 : i64} {
  func.func @_qnet_kernel(%arg0: memref<36x4608xbf16, #tpu.memory_space<vmem>>, %arg1: memref<4x36xbf16, #tpu.memory_space<vmem>>, %arg2: memref<4x1xf32, #tpu.memory_space<vmem>>, %arg3: memref<9x4x4xbf16, #tpu.memory_space<vmem>>, %arg4: memref<4x1xf32, #tpu.memory_space<vmem>>, %arg5: memref<1024x128xbf16, #tpu.memory_space<vmem>>, %arg6: memref<1x128xf32, #tpu.memory_space<vmem>>, %arg7: memref<128x128xbf16, #tpu.memory_space<vmem>>, %arg8: memref<1x128xf32, #tpu.memory_space<vmem>>, %arg9: memref<128x128xbf16, #tpu.memory_space<vmem>>, %arg10: memref<1x128xf32, #tpu.memory_space<vmem>>, %arg11: memref<2x128xf32, #tpu.memory_space<vmem>>, %arg12: memref<2x1024xf32, #tpu.memory_space<vmem>>) attributes {dimension_semantics = [], scalar_prefetch = 0 : i64, scratch_operands = 1 : i64, tpu.core_type = #tpu.core_type<tc>} {
    %c0 = arith.constant 0 : index
    %c0_0 = arith.constant 0 : index
    %0 = vector.load %arg1[%c0, %c0_0] : memref<4x36xbf16, #tpu.memory_space<vmem>>, vector<4x36xbf16>
    %c0_1 = arith.constant 0 : index
    %c0_2 = arith.constant 0 : index
    %1 = vector.load %arg0[%c0_1, %c0_2] : memref<36x4608xbf16, #tpu.memory_space<vmem>>, vector<36x4608xbf16>
    %cst = arith.constant dense<0.000000e+00> : vector<4x4608xf32>
    %2 = tpu.matmul %0, %1, %cst {dimension_numbers = #tpu.dot_dimension_numbers<[1], [0], [0], [1], [0, 0, 1, 1], [], []>} : vector<4x36xbf16>, vector<36x4608xbf16>, vector<4x4608xf32> -> vector<4x4608xf32>
    %c0_3 = arith.constant 0 : index
    %c0_4 = arith.constant 0 : index
    %3 = vector.load %arg2[%c0_3, %c0_4] : memref<4x1xf32, #tpu.memory_space<vmem>>, vector<4x1xf32>
    %4 = vector.shape_cast %3 : vector<4x1xf32> to vector<4x1xf32>
    %5 = vector.broadcast %4 : vector<4x1xf32> to vector<4x4608xf32>
    %6 = arith.addf %2, %5 : vector<4x4608xf32>
    %cst_5 = arith.constant 0.000000e+00 : f32
    %7 = vector.broadcast %cst_5 : f32 to vector<4x4608xf32>
    %8 = arith.maximumf %6, %7 : vector<4x4608xf32>
    %9 = arith.truncf %8 : vector<4x4608xf32> to vector<4x4608xbf16>
    %cst_6 = arith.constant 0.000000e+00 : f32
    %10 = vector.broadcast %cst_6 : f32 to vector<4x512xf32>
    %c0_7 = arith.constant 0 : index
    %c0_8 = arith.constant 0 : index
    %c0_9 = arith.constant 0 : index
    %11 = vector.load %arg3[%c0_7, %c0_8, %c0_9] : memref<9x4x4xbf16, #tpu.memory_space<vmem>>, vector<1x4x4xbf16>
    %12 = vector.shape_cast %11 : vector<1x4x4xbf16> to vector<4x4xbf16>
    %13 = vector.extract_strided_slice %9 {offsets = [0, 0], sizes = [4, 512], strides = [1, 1]} : vector<4x4608xbf16> to vector<4x512xbf16>
    %cst_10 = arith.constant dense<0.000000e+00> : vector<4x512xf32>
    %14 = tpu.matmul %12, %13, %cst_10 {dimension_numbers = #tpu.dot_dimension_numbers<[1], [0], [0], [1], [0, 0, 1, 1], [], []>} : vector<4x4xbf16>, vector<4x512xbf16>, vector<4x512xf32> -> vector<4x512xf32>
    %15 = arith.addf %10, %14 : vector<4x512xf32>
    %c1 = arith.constant 1 : index
    %c0_11 = arith.constant 0 : index
    %c0_12 = arith.constant 0 : index
    %16 = vector.load %arg3[%c1, %c0_11, %c0_12] : memref<9x4x4xbf16, #tpu.memory_space<vmem>>, vector<1x4x4xbf16>
    %17 = vector.shape_cast %16 : vector<1x4x4xbf16> to vector<4x4xbf16>
    %18 = vector.extract_strided_slice %9 {offsets = [0, 512], sizes = [4, 512], strides = [1, 1]} : vector<4x4608xbf16> to vector<4x512xbf16>
    %cst_13 = arith.constant dense<0.000000e+00> : vector<4x512xf32>
    %19 = tpu.matmul %17, %18, %cst_13 {dimension_numbers = #tpu.dot_dimension_numbers<[1], [0], [0], [1], [0, 0, 1, 1], [], []>} : vector<4x4xbf16>, vector<4x512xbf16>, vector<4x512xf32> -> vector<4x512xf32>
    %20 = arith.addf %15, %19 : vector<4x512xf32>
    %c2 = arith.constant 2 : index
    %c0_14 = arith.constant 0 : index
    %c0_15 = arith.constant 0 : index
    %21 = vector.load %arg3[%c2, %c0_14, %c0_15] : memref<9x4x4xbf16, #tpu.memory_space<vmem>>, vector<1x4x4xbf16>
    %22 = vector.shape_cast %21 : vector<1x4x4xbf16> to vector<4x4xbf16>
    %23 = vector.extract_strided_slice %9 {offsets = [0, 1024], sizes = [4, 512], strides = [1, 1]} : vector<4x4608xbf16> to vector<4x512xbf16>
    %cst_16 = arith.constant dense<0.000000e+00> : vector<4x512xf32>
    %24 = tpu.matmul %22, %23, %cst_16 {dimension_numbers = #tpu.dot_dimension_numbers<[1], [0], [0], [1], [0, 0, 1, 1], [], []>} : vector<4x4xbf16>, vector<4x512xbf16>, vector<4x512xf32> -> vector<4x512xf32>
    %25 = arith.addf %20, %24 : vector<4x512xf32>
    %c3 = arith.constant 3 : index
    %c0_17 = arith.constant 0 : index
    %c0_18 = arith.constant 0 : index
    %26 = vector.load %arg3[%c3, %c0_17, %c0_18] : memref<9x4x4xbf16, #tpu.memory_space<vmem>>, vector<1x4x4xbf16>
    %27 = vector.shape_cast %26 : vector<1x4x4xbf16> to vector<4x4xbf16>
    %28 = vector.extract_strided_slice %9 {offsets = [0, 1536], sizes = [4, 512], strides = [1, 1]} : vector<4x4608xbf16> to vector<4x512xbf16>
    %cst_19 = arith.constant dense<0.000000e+00> : vector<4x512xf32>
    %29 = tpu.matmul %27, %28, %cst_19 {dimension_numbers = #tpu.dot_dimension_numbers<[1], [0], [0], [1], [0, 0, 1, 1], [], []>} : vector<4x4xbf16>, vector<4x512xbf16>, vector<4x512xf32> -> vector<4x512xf32>
    %30 = arith.addf %25, %29 : vector<4x512xf32>
    %c4 = arith.constant 4 : index
    %c0_20 = arith.constant 0 : index
    %c0_21 = arith.constant 0 : index
    %31 = vector.load %arg3[%c4, %c0_20, %c0_21] : memref<9x4x4xbf16, #tpu.memory_space<vmem>>, vector<1x4x4xbf16>
    %32 = vector.shape_cast %31 : vector<1x4x4xbf16> to vector<4x4xbf16>
    %33 = vector.extract_strided_slice %9 {offsets = [0, 2048], sizes = [4, 512], strides = [1, 1]} : vector<4x4608xbf16> to vector<4x512xbf16>
    %cst_22 = arith.constant dense<0.000000e+00> : vector<4x512xf32>
    %34 = tpu.matmul %32, %33, %cst_22 {dimension_numbers = #tpu.dot_dimension_numbers<[1], [0], [0], [1], [0, 0, 1, 1], [], []>} : vector<4x4xbf16>, vector<4x512xbf16>, vector<4x512xf32> -> vector<4x512xf32>
    %35 = arith.addf %30, %34 : vector<4x512xf32>
    %c5 = arith.constant 5 : index
    %c0_23 = arith.constant 0 : index
    %c0_24 = arith.constant 0 : index
    %36 = vector.load %arg3[%c5, %c0_23, %c0_24] : memref<9x4x4xbf16, #tpu.memory_space<vmem>>, vector<1x4x4xbf16>
    %37 = vector.shape_cast %36 : vector<1x4x4xbf16> to vector<4x4xbf16>
    %38 = vector.extract_strided_slice %9 {offsets = [0, 2560], sizes = [4, 512], strides = [1, 1]} : vector<4x4608xbf16> to vector<4x512xbf16>
    %cst_25 = arith.constant dense<0.000000e+00> : vector<4x512xf32>
    %39 = tpu.matmul %37, %38, %cst_25 {dimension_numbers = #tpu.dot_dimension_numbers<[1], [0], [0], [1], [0, 0, 1, 1], [], []>} : vector<4x4xbf16>, vector<4x512xbf16>, vector<4x512xf32> -> vector<4x512xf32>
    %40 = arith.addf %35, %39 : vector<4x512xf32>
    %c6 = arith.constant 6 : index
    %c0_26 = arith.constant 0 : index
    %c0_27 = arith.constant 0 : index
    %41 = vector.load %arg3[%c6, %c0_26, %c0_27] : memref<9x4x4xbf16, #tpu.memory_space<vmem>>, vector<1x4x4xbf16>
    %42 = vector.shape_cast %41 : vector<1x4x4xbf16> to vector<4x4xbf16>
    %43 = vector.extract_strided_slice %9 {offsets = [0, 3072], sizes = [4, 512], strides = [1, 1]} : vector<4x4608xbf16> to vector<4x512xbf16>
    %cst_28 = arith.constant dense<0.000000e+00> : vector<4x512xf32>
    %44 = tpu.matmul %42, %43, %cst_28 {dimension_numbers = #tpu.dot_dimension_numbers<[1], [0], [0], [1], [0, 0, 1, 1], [], []>} : vector<4x4xbf16>, vector<4x512xbf16>, vector<4x512xf32> -> vector<4x512xf32>
    %45 = arith.addf %40, %44 : vector<4x512xf32>
    %c7 = arith.constant 7 : index
    %c0_29 = arith.constant 0 : index
    %c0_30 = arith.constant 0 : index
    %46 = vector.load %arg3[%c7, %c0_29, %c0_30] : memref<9x4x4xbf16, #tpu.memory_space<vmem>>, vector<1x4x4xbf16>
    %47 = vector.shape_cast %46 : vector<1x4x4xbf16> to vector<4x4xbf16>
    %48 = vector.extract_strided_slice %9 {offsets = [0, 3584], sizes = [4, 512], strides = [1, 1]} : vector<4x4608xbf16> to vector<4x512xbf16>
    %cst_31 = arith.constant dense<0.000000e+00> : vector<4x512xf32>
    %49 = tpu.matmul %47, %48, %cst_31 {dimension_numbers = #tpu.dot_dimension_numbers<[1], [0], [0], [1], [0, 0, 1, 1], [], []>} : vector<4x4xbf16>, vector<4x512xbf16>, vector<4x512xf32> -> vector<4x512xf32>
    %50 = arith.addf %45, %49 : vector<4x512xf32>
    %c8 = arith.constant 8 : index
    %c0_32 = arith.constant 0 : index
    %c0_33 = arith.constant 0 : index
    %51 = vector.load %arg3[%c8, %c0_32, %c0_33] : memref<9x4x4xbf16, #tpu.memory_space<vmem>>, vector<1x4x4xbf16>
    %52 = vector.shape_cast %51 : vector<1x4x4xbf16> to vector<4x4xbf16>
    %53 = vector.extract_strided_slice %9 {offsets = [0, 4096], sizes = [4, 512], strides = [1, 1]} : vector<4x4608xbf16> to vector<4x512xbf16>
    %cst_34 = arith.constant dense<0.000000e+00> : vector<4x512xf32>
    %54 = tpu.matmul %52, %53, %cst_34 {dimension_numbers = #tpu.dot_dimension_numbers<[1], [0], [0], [1], [0, 0, 1, 1], [], []>} : vector<4x4xbf16>, vector<4x512xbf16>, vector<4x512xf32> -> vector<4x512xf32>
    %55 = arith.addf %50, %54 : vector<4x512xf32>
    %c0_35 = arith.constant 0 : index
    %c0_36 = arith.constant 0 : index
    %56 = vector.load %arg4[%c0_35, %c0_36] : memref<4x1xf32, #tpu.memory_space<vmem>>, vector<4x1xf32>
    %57 = vector.shape_cast %56 : vector<4x1xf32> to vector<4x1xf32>
    %58 = vector.broadcast %57 : vector<4x1xf32> to vector<4x512xf32>
    %59 = arith.addf %55, %58 : vector<4x512xf32>
    %cst_37 = arith.constant 0.000000e+00 : f32
    %60 = vector.broadcast %cst_37 : f32 to vector<4x512xf32>
    %61 = arith.maximumf %59, %60 : vector<4x512xf32>
    %62 = vector.extract_strided_slice %61 {offsets = [0, 0], sizes = [1, 256], strides = [1, 1]} : vector<4x512xf32> to vector<1x256xf32>
    %c0_38 = arith.constant 0 : index
    %c0_39 = arith.constant 0 : index
    %63 = vector.load %arg12[%c0_38, %c0_39] : memref<2x1024xf32, #tpu.memory_space<vmem>>, vector<1x256xf32>
    tpu.vector_store %arg12[%c0_38, %c0_39], %62 {strides = array<i32>} : memref<2x1024xf32, #tpu.memory_space<vmem>>, vector<1x256xf32>,
    %64 = vector.extract_strided_slice %61 {offsets = [0, 256], sizes = [1, 256], strides = [1, 1]} : vector<4x512xf32> to vector<1x256xf32>
    %c1_40 = arith.constant 1 : index
    %c0_41 = arith.constant 0 : index
    %65 = vector.load %arg12[%c1_40, %c0_41] : memref<2x1024xf32, #tpu.memory_space<vmem>>, vector<1x256xf32>
    tpu.vector_store %arg12[%c1_40, %c0_41], %64 {strides = array<i32>} : memref<2x1024xf32, #tpu.memory_space<vmem>>, vector<1x256xf32>,
    %66 = vector.extract_strided_slice %61 {offsets = [1, 0], sizes = [1, 256], strides = [1, 1]} : vector<4x512xf32> to vector<1x256xf32>
    %c0_42 = arith.constant 0 : index
    %c256 = arith.constant 256 : index
    %67 = vector.load %arg12[%c0_42, %c256] : memref<2x1024xf32, #tpu.memory_space<vmem>>, vector<1x256xf32>
    tpu.vector_store %arg12[%c0_42, %c256], %66 {strides = array<i32>} : memref<2x1024xf32, #tpu.memory_space<vmem>>, vector<1x256xf32>,
    %68 = vector.extract_strided_slice %61 {offsets = [1, 256], sizes = [1, 256], strides = [1, 1]} : vector<4x512xf32> to vector<1x256xf32>
    %c1_43 = arith.constant 1 : index
    %c256_44 = arith.constant 256 : index
    %69 = vector.load %arg12[%c1_43, %c256_44] : memref<2x1024xf32, #tpu.memory_space<vmem>>, vector<1x256xf32>
    tpu.vector_store %arg12[%c1_43, %c256_44], %68 {strides = array<i32>} : memref<2x1024xf32, #tpu.memory_space<vmem>>, vector<1x256xf32>,
    %70 = vector.extract_strided_slice %61 {offsets = [2, 0], sizes = [1, 256], strides = [1, 1]} : vector<4x512xf32> to vector<1x256xf32>
    %c0_45 = arith.constant 0 : index
    %c512 = arith.constant 512 : index
    %71 = vector.load %arg12[%c0_45, %c512] : memref<2x1024xf32, #tpu.memory_space<vmem>>, vector<1x256xf32>
    tpu.vector_store %arg12[%c0_45, %c512], %70 {strides = array<i32>} : memref<2x1024xf32, #tpu.memory_space<vmem>>, vector<1x256xf32>,
    %72 = vector.extract_strided_slice %61 {offsets = [2, 256], sizes = [1, 256], strides = [1, 1]} : vector<4x512xf32> to vector<1x256xf32>
    %c1_46 = arith.constant 1 : index
    %c512_47 = arith.constant 512 : index
    %73 = vector.load %arg12[%c1_46, %c512_47] : memref<2x1024xf32, #tpu.memory_space<vmem>>, vector<1x256xf32>
    tpu.vector_store %arg12[%c1_46, %c512_47], %72 {strides = array<i32>} : memref<2x1024xf32, #tpu.memory_space<vmem>>, vector<1x256xf32>,
    %74 = vector.extract_strided_slice %61 {offsets = [3, 0], sizes = [1, 256], strides = [1, 1]} : vector<4x512xf32> to vector<1x256xf32>
    %c0_48 = arith.constant 0 : index
    %c768 = arith.constant 768 : index
    %75 = vector.load %arg12[%c0_48, %c768] : memref<2x1024xf32, #tpu.memory_space<vmem>>, vector<1x256xf32>
    tpu.vector_store %arg12[%c0_48, %c768], %74 {strides = array<i32>} : memref<2x1024xf32, #tpu.memory_space<vmem>>, vector<1x256xf32>,
    %76 = vector.extract_strided_slice %61 {offsets = [3, 256], sizes = [1, 256], strides = [1, 1]} : vector<4x512xf32> to vector<1x256xf32>
    %c1_49 = arith.constant 1 : index
    %c768_50 = arith.constant 768 : index
    %77 = vector.load %arg12[%c1_49, %c768_50] : memref<2x1024xf32, #tpu.memory_space<vmem>>, vector<1x256xf32>
    tpu.vector_store %arg12[%c1_49, %c768_50], %76 {strides = array<i32>} : memref<2x1024xf32, #tpu.memory_space<vmem>>, vector<1x256xf32>,
    %c0_51 = arith.constant 0 : index
    %c0_52 = arith.constant 0 : index
    %78 = vector.load %arg12[%c0_51, %c0_52] : memref<2x1024xf32, #tpu.memory_space<vmem>>, vector<2x1024xf32>
    %79 = arith.truncf %78 : vector<2x1024xf32> to vector<2x1024xbf16>
    %c0_53 = arith.constant 0 : index
    %c0_54 = arith.constant 0 : index
    %80 = vector.load %arg5[%c0_53, %c0_54] : memref<1024x128xbf16, #tpu.memory_space<vmem>>, vector<1024x128xbf16>
    %cst_55 = arith.constant dense<0.000000e+00> : vector<2x128xf32>
    %81 = tpu.matmul %79, %80, %cst_55 {dimension_numbers = #tpu.dot_dimension_numbers<[1], [0], [0], [1], [0, 0, 1, 1], [], []>} : vector<2x1024xbf16>, vector<1024x128xbf16>, vector<2x128xf32> -> vector<2x128xf32>
    %c0_56 = arith.constant 0 : index
    %c0_57 = arith.constant 0 : index
    %82 = vector.load %arg6[%c0_56, %c0_57] : memref<1x128xf32, #tpu.memory_space<vmem>>, vector<1x128xf32>
    %83 = vector.broadcast %82 : vector<1x128xf32> to vector<2x128xf32>
    %84 = arith.addf %81, %83 : vector<2x128xf32>
    %cst_58 = arith.constant 0.000000e+00 : f32
    %85 = vector.broadcast %cst_58 : f32 to vector<2x128xf32>
    %86 = arith.maximumf %84, %85 : vector<2x128xf32>
    %87 = arith.truncf %86 : vector<2x128xf32> to vector<2x128xbf16>
    %c0_59 = arith.constant 0 : index
    %c0_60 = arith.constant 0 : index
    %88 = vector.load %arg7[%c0_59, %c0_60] : memref<128x128xbf16, #tpu.memory_space<vmem>>, vector<128x128xbf16>
    %cst_61 = arith.constant dense<0.000000e+00> : vector<2x128xf32>
    %89 = tpu.matmul %87, %88, %cst_61 {dimension_numbers = #tpu.dot_dimension_numbers<[1], [0], [0], [1], [0, 0, 1, 1], [], []>} : vector<2x128xbf16>, vector<128x128xbf16>, vector<2x128xf32> -> vector<2x128xf32>
    %c0_62 = arith.constant 0 : index
    %c0_63 = arith.constant 0 : index
    %90 = vector.load %arg8[%c0_62, %c0_63] : memref<1x128xf32, #tpu.memory_space<vmem>>, vector<1x128xf32>
    %91 = vector.broadcast %90 : vector<1x128xf32> to vector<2x128xf32>
    %92 = arith.addf %89, %91 : vector<2x128xf32>
    %cst_64 = arith.constant 0.000000e+00 : f32
    %93 = vector.broadcast %cst_64 : f32 to vector<2x128xf32>
    %94 = arith.maximumf %92, %93 : vector<2x128xf32>
    %95 = arith.truncf %94 : vector<2x128xf32> to vector<2x128xbf16>
    %c0_65 = arith.constant 0 : index
    %c0_66 = arith.constant 0 : index
    %96 = vector.load %arg9[%c0_65, %c0_66] : memref<128x128xbf16, #tpu.memory_space<vmem>>, vector<128x128xbf16>
    %cst_67 = arith.constant dense<0.000000e+00> : vector<2x128xf32>
    %97 = tpu.matmul %95, %96, %cst_67 {dimension_numbers = #tpu.dot_dimension_numbers<[1], [0], [0], [1], [0, 0, 1, 1], [], []>} : vector<2x128xbf16>, vector<128x128xbf16>, vector<2x128xf32> -> vector<2x128xf32>
    %c0_68 = arith.constant 0 : index
    %c0_69 = arith.constant 0 : index
    %98 = vector.load %arg10[%c0_68, %c0_69] : memref<1x128xf32, #tpu.memory_space<vmem>>, vector<1x128xf32>
    %99 = vector.broadcast %98 : vector<1x128xf32> to vector<2x128xf32>
    %100 = arith.addf %97, %99 : vector<2x128xf32>
    %c0_70 = arith.constant 0 : index
    %c0_71 = arith.constant 0 : index
    %101 = vector.load %arg11[%c0_70, %c0_71] : memref<2x128xf32, #tpu.memory_space<vmem>>, vector<2x128xf32>
    tpu.vector_store %arg11[%c0_70, %c0_71], %100 {strides = array<i32>} : memref<2x128xf32, #tpu.memory_space<vmem>>, vector<2x128xf32>,
    return
  }
}

</mosaic_0001>

<bundles_post_ra>
// kernel: qnetwork_forward.1
= control target key start
LH: loop header
LB: loop body
LE: loop exit
PB: predicated region body
PF: predicated region fallthrough
CT: control target
= control target key end

     0   :  { %v4172_v2 = vmov 0   ;;  %vm591_vm0 = vcmask 1041408   ;;  %vm587_vm1 = vcmask 293888   ;;  %s5124_s0 = inlined_call_operand.vmem [shape: bf16[36,4608], index: 0, kind: input, shape index: {}]   ;;  %s5125_s1 = inlined_call_operand.vmem [shape: bf16[4,36], index: 1, kind: input, shape index: {}]   ;;  %s5126_s2 = inlined_call_operand.vmem [shape: f32[4,1], index: 2, kind: input, shape index: {}]   ;;  %s5127_s3 = inlined_call_operand.vmem [shape: bf16[9,4,4], index: 3, kind: input, shape index: {}]   ;;  %s5128_s4 = inlined_call_operand.vmem [shape: f32[4,1], index: 4, kind: input, shape index: {}]   ;;  %s5129_s5 = inlined_call_operand.vmem [shape: bf16[1024,128], index: 5, kind: input, shape index: {}]   ;;  %s5130_s6 = inlined_call_operand.vmem [shape: f32[1,128], index: 6, kind: input, shape index: {}]   ;;  %s5131_s7 = inlined_call_operand.vmem [shape: bf16[128,128], index: 7, kind: input, shape index: {}]   ;;  %s5132_s8 = inlined_call_operand.vmem [shape: f32[1,128], index: 8, kind: input, shape index: {}]   ;;  %s5133_s9 = inlined_call_operand.vmem [shape: bf16[128,128], index: 9, kind: input, shape index: {}]   ;;  %s5134_s10 = inlined_call_operand.vmem [shape: f32[1,128], index: 10, kind: input, shape index: {}]   ;;  %s5135_s11 = inlined_call_operand.hbm [shape: f32[2,128], index: 11, kind: output, shape index: {}]  }
   0x1   :  { %v3922_v0 = vld [vmem:[%s5124_s0 + $0x4] ss:$144 sps:$4 sm:$0xff]   ;;  %v3924_v1 = vld [vmem:[%s5124_s0 + $0xc] ss:$144 sps:$4 sm:$0xff]   ;;  %732 = vmatprep.mubr.bf16.mxu0 %v4172_v2  ;;  %773 = vmatprep.mubr.bf16.mxu1 %v4172_v2  ;;  %v3926_v3 = vld [vmem:[%s5124_s0] ss:$144 sps:$4 sm:$0xff]  }
   0x2   :  { %700 = vmatprep.subr.bf16.mxu0 %v3922_v0  ;;  %v3927_v4 = vld [vmem:[%s5124_s0 + $0x8] ss:$144 sps:$4 sm:$0xff]   ;;  %3921 = vset.pattern.permute.xlu0 %v4172_v2  ;;  %v3928_v5 = vld [vmem:[%s5124_s0 + $0x124] ss:$144 sps:$4 sm:$0xff]   ;;  %v3930_v6 = vld [vmem:[%s5124_s0 + $0x12c] ss:$144 sps:$4 sm:$0xff]  }
   0x3   :  { %741 = vmatprep.subr.bf16.mxu1 %v3924_v1  ;;  %701 = vmatpush1.bf16.msra.mxu0 %v3926_v3  ;;  %v3932_v7 = vld [vmem:[%s5124_s0 + $0x120] ss:$144 sps:$4 sm:$0xff]   ;;  %v3933_v8 = vld [vmem:[%s5124_s0 + $0x128] ss:$144 sps:$4 sm:$0xff]   ;;  %v3940_v15 = vld [vmem:[%s5124_s0 + $0x14] ss:$144 sps:$4 sm:$0xff]  }
   0x4   :  { %742 = vmatpush1.bf16.msra.mxu1 %v3927_v4  ;;  %702 = vmatprep.subr.bf16.mxu0 %v3928_v5  ;;  %v113_v9 = vld [vmem:[%s5124_s0 + $0x240] sm:$0x33]  ;;  %v114_v10 = vld [vmem:[%s5124_s0 + $0x248] sm:$0x33]  ;;  %v115_v24 = vld [vmem:[%s5124_s0 + $0x250] sm:$0x33] }
   0x5   :  { %743 = vmatprep.subr.bf16.mxu1 %v3930_v6  ;;  %v3571_v11 = vcombine.high %v113_v9, %v113_v9  ;;  %v3573_v12 = vcombine.high %v114_v10, %v114_v10  ;;  %v3570_v13 = vcombine.low %v113_v9, %v113_v9  ;;  %v3572_v14 = vcombine.low %v114_v10, %v114_v10  ;;  %v3943_v18 = vld [vmem:[%s5124_s0 + $0x1c] ss:$144 sps:$4 sm:$0xff]   ;;  %v4284_v19 = vld [vmem:[%s5125_s1] sm:$0x3]  ;;  %v3941_v21 = vld [vmem:[%s5124_s0 + $0x18] ss:$144 sps:$4 sm:$0xff]  }
   0x6   :  { %v3938_v20 = vld [vmem:[%s5124_s0 + $0x10] ss:$144 sps:$4 sm:$0xff]   ;;  %v3946_v22 = vld [vmem:[%s5124_s0 + $0x134] ss:$144 sps:$4 sm:$0xff]   ;;  %v3949_v23 = vld [vmem:[%s5124_s0 + $0x13c] ss:$144 sps:$4 sm:$0xff]   ;;  %v3575_v28 = vcombine.high %v115_v24, %v115_v24  ;;  %v3574_v30 = vcombine.low %v115_v24, %v115_v24 }
   0x7   :  { %703 = vmatpush1.bf16.msra.mxu0 %v3932_v7  ;;  %v593_v16 = vsel %vm591_vm0, %v3570_v13, 0  ;;  %v599_v17 = vsel %vm591_vm0, %v3572_v14, 0  ;;  %v116_v25 = vld [vmem:[%s5124_s0 + $0x258] sm:$0x33]  ;;  %v3944_v26 = vld [vmem:[%s5124_s0 + $0x130] ss:$144 sps:$4 sm:$0xff]  }
   0x8   :  { %744 = vmatpush1.bf16.msra.mxu1 %v3933_v8  ;;  %3606 = vmatprep.subr.msk.bf16.mxu0 %vm591_vm0, %v3571_v11  ;;  %v3947_v27 = vld [vmem:[%s5124_s0 + $0x138] ss:$144 sps:$4 sm:$0xff]   ;;  %v3577_v29 = vcombine.high %v116_v25, %v116_v25  ;;  %v3576_v31 = vcombine.low %v116_v25, %v116_v25  ;;  %v3956_v32 = vld [vmem:[%s5124_s0 + $0x24] ss:$144 sps:$4 sm:$0xff]   ;;  %v605_v33 = vsel %vm591_vm0, %v3574_v30, 0 }
   0x9   :  { %3608 = vmatprep.subr.msk.bf16.mxu1 %vm591_vm0, %v3573_v12  ;;  %v3959_v35 = vld [vmem:[%s5124_s0 + $0x2c] ss:$144 sps:$4 sm:$0xff]   ;;  %v3954_v36 = vld [vmem:[%s5124_s0 + $0x20] ss:$144 sps:$4 sm:$0xff]   ;;  %v3957_v37 = vld [vmem:[%s5124_s0 + $0x28] ss:$144 sps:$4 sm:$0xff]  }
   0xa   :  { %v611_v34 = vsel %vm591_vm0, %v3576_v31, 0  ;;  %v3962_v38 = vld [vmem:[%s5124_s0 + $0x144] ss:$144 sps:$4 sm:$0xff]   ;;  %v3965_v39 = vld [vmem:[%s5124_s0 + $0x14c] ss:$144 sps:$4 sm:$0xff]  }
   0xb   :  { %705 = vmatpush1.bf16.msra.mxu0 %v593_v16  ;;  %v117_v40 = vld [vmem:[%s5124_s0 + $0x260] sm:$0x33]  ;;  %v118_v41 = vld [vmem:[%s5124_s0 + $0x268] sm:$0x33]  ;;  %v119_v56 = vld [vmem:[%s5124_s0 + $0x270] sm:$0x33] }
   0xc   :  { %746 = vmatpush1.bf16.msra.mxu1 %v599_v17  ;;  %782 = vmatprep.subr.bf16.mxu0 %v3940_v15  ;;  %v3960_v42 = vld [vmem:[%s5124_s0 + $0x140] ss:$144 sps:$4 sm:$0xff]   ;;  %v3963_v43 = vld [vmem:[%s5124_s0 + $0x148] ss:$144 sps:$4 sm:$0xff]   ;;  %v3579_v44 = vcombine.high %v117_v40, %v117_v40  ;;  %v3581_v45 = vcombine.high %v118_v41, %v118_v41  ;;  %v3578_v46 = vcombine.low %v117_v40, %v117_v40  ;;  %v3972_v48 = vld [vmem:[%s5124_s0 + $0x34] ss:$144 sps:$4 sm:$0xff]  }
   0xd   :  { %823 = vmatprep.subr.bf16.mxu1 %v3943_v18  ;;  %v3580_v47 = vcombine.low %v118_v41, %v118_v41  ;;  %v3975_v51 = vld [vmem:[%s5124_s0 + $0x3c] ss:$144 sps:$4 sm:$0xff]   ;;  %v3970_v52 = vld [vmem:[%s5124_s0 + $0x30] ss:$144 sps:$4 sm:$0xff]   ;;  %v3973_v53 = vld [vmem:[%s5124_s0 + $0x38] ss:$144 sps:$4 sm:$0xff]   ;;  %v3583_v60 = vcombine.high %v119_v56, %v119_v56  ;;  %v3582_v62 = vcombine.low %v119_v56, %v119_v56 }
   0xe   :  { %3607 = vmatmul.mubr.msk.bf16.vlgmr.msra.gmra.mrb[0].mxu0 %vm587_vm1, %v4284_v19  ;;  %v617_v49 = vsel %vm591_vm0, %v3578_v46, 0  ;;  %v3978_v54 = vld [vmem:[%s5124_s0 + $0x154] ss:$144 sps:$4 sm:$0xff]   ;;  %v3981_v55 = vld [vmem:[%s5124_s0 + $0x15c] ss:$144 sps:$4 sm:$0xff]  }
   0xf   :  { %3609 = vmatmul.mubr.msk.bf16.vlgmr.msra.gmra.mrb[0].mxu1 %vm587_vm1, %v4284_v19  ;;  %783 = vmatpush1.bf16.msra.mxu0 %v3938_v20  ;;  %v623_v50 = vsel %vm591_vm0, %v3580_v47, 0  ;;  %v120_v57 = vld [vmem:[%s5124_s0 + $0x278] sm:$0x33]  ;;  %v3976_v58 = vld [vmem:[%s5124_s0 + $0x150] ss:$144 sps:$4 sm:$0xff]   ;;  %v629_v7 = vsel %vm591_vm0, %v3582_v62, 0 }
  0x10   :  { %824 = vmatpush1.bf16.msra.mxu1 %v3941_v21  ;;  %784 = vmatprep.subr.bf16.mxu0 %v3946_v22  ;;  %v3979_v59 = vld [vmem:[%s5124_s0 + $0x158] ss:$144 sps:$4 sm:$0xff]   ;;  %v3585_v61 = vcombine.high %v120_v57, %v120_v57  ;;  %v3584_v63 = vcombine.low %v120_v57, %v120_v57  ;;  %v3988_v0 = vld [vmem:[%s5124_s0 + $0x44] ss:$144 sps:$4 sm:$0xff]   ;;  %v3991_v1 = vld [vmem:[%s5124_s0 + $0x4c] ss:$144 sps:$4 sm:$0xff]  }
  0x11   :  { %825 = vmatprep.subr.bf16.mxu1 %v3949_v23  ;;  %814 = vmatprep.mubr.bf16.mxu0 %v4172_v2  ;;  %v121_v3 = vld [vmem:[%s5124_s0 + $0x280] sm:$0x33]  ;;  %v122_v4 = vld [vmem:[%s5124_s0 + $0x288] sm:$0x33]  ;;  %v4411_v5 = vld [vmem:[%s5124_s0 + $0x290] sm:$0x33] }
  0x12   :  { %855 = vmatprep.mubr.bf16.mxu1 %v4172_v2  ;;  %v4416_v6 = vld [vmem:[%s5124_s0 + $0x298] sm:$0x33]  ;;  %v635_v8 = vsel %vm591_vm0, %v3584_v63, 0  ;;  %v4425_v9 = vld [vmem:[%s5124_s0 + $0x2a0] sm:$0x33]  ;;  %v3586_v13 = vcombine.low %v121_v3, %v121_v3  ;;  %v3588_v14 = vcombine.low %v122_v4, %v122_v4  ;;  %v3590_v16 = vcombine.low %v4411_v5, %v4411_v5 }
  0x13   :  { %785 = vmatpush1.bf16.msra.mxu0 %v3944_v26  ;;  %v4430_v10 = vld [vmem:[%s5124_s0 + $0x2a8] sm:$0x33]  ;;  %v3986_v11 = vld [vmem:[%s5124_s0 + $0x40] ss:$144 sps:$4 sm:$0xff]   ;;  %v3592_v17 = vcombine.low %v4416_v6, %v4416_v6  ;;  %v3594_v18 = vcombine.low %v4425_v9, %v4425_v9  ;;  %v4452_v20 = vld [vmem:[%s5124_s0 + $0x2b8] sm:$0x33]  ;;  %v3589_v30 = vcombine.high %v122_v4, %v122_v4 }
  0x14   :  { %826 = vmatpush1.bf16.msra.mxu1 %v3947_v27  ;;  %3610 = vmatprep.subr.msk.bf16.mxu0 %vm591_vm0, %v3575_v28  ;;  %v3989_v12 = vld [vmem:[%s5124_s0 + $0x48] ss:$144 sps:$4 sm:$0xff]   ;;  %v4441_v15 = vld [vmem:[%s5124_s0 + $0x2b0] sm:$0x33]  ;;  %v3997_v22 = vld [vmem:[%s5124_s0 + $0x16c] ss:$144 sps:$4 sm:$0xff]   ;;  %v3596_v23 = vcombine.low %v4430_v10, %v4430_v10  ;;  %v3600_v25 = vcombine.low %v4452_v20, %v4452_v20  ;;  %v3587_v28 = vcombine.high %v121_v3, %v121_v3 }
  0x15   :  { %3612 = vmatprep.subr.msk.bf16.mxu1 %vm591_vm0, %v3577_v29  ;;  %v3994_v21 = vld [vmem:[%s5124_s0 + $0x164] ss:$144 sps:$4 sm:$0xff]   ;;  %v3598_v24 = vcombine.low %v4441_v15, %v4441_v15  ;;  %v3992_v26 = vld [vmem:[%s5124_s0 + $0x160] ss:$144 sps:$4 sm:$0xff]   ;;  %v3995_v27 = vld [vmem:[%s5124_s0 + $0x168] ss:$144 sps:$4 sm:$0xff]  }
  0x16   :  { %v641_v29 = vsel %vm591_vm0, %v3586_v13, 0  ;;  %v647_v31 = vsel %vm591_vm0, %v3588_v14, 0  ;;  %v4505_v40 = vld [vmem:[%s5124_s0 + $0x2c8] sm:$0x33]  ;;  %v2429_v41 = vld [vmem:[%s5128_s4] sm:$0xf] }
  0x17   :  { %787 = vmatpush1.bf16.msra.mxu0 %v605_v33  ;;  %v659_v33 = vsel %vm591_vm0, %v3592_v17, 0  ;;  %v4020_v56 = vld [vmem:[%s5124_s0 + $0x64] ss:$144 sps:$4 sm:$0xff]   ;;  %v4023_v57 = vld [vmem:[%s5124_s0 + $0x6c] ss:$144 sps:$4 sm:$0xff]  }
  0x18   :  { %828 = vmatpush1.bf16.msra.mxu1 %v611_v34  ;;  %864 = vmatprep.subr.bf16.mxu0 %v3956_v32  ;;  %v653_v32 = vsel %vm591_vm0, %v3590_v16, 0  ;;  %v131_v34 = vld [vmem:[%s5126_s2] sm:$0xf]  ;;  %v4027_v63 = vld [vmem:[%s5124_s0 + $0x188] ss:$144 sps:$4 sm:$0xff]  }
  0x19   :  { %905 = vmatprep.subr.bf16.mxu1 %v3959_v35  ;;  %v4484_v35 = vsel %vm591_vm0, %v3594_v18, 0  ;;  %134 = vperm.xlu0 %3921, %v131_v34   ;;  %v4024_v62 = vld [vmem:[%s5124_s0 + $0x180] ss:$144 sps:$4 sm:$0xff]   ;;  %v4036_v3 = vld [vmem:[%s5124_s0 + $0x74] ss:$144 sps:$4 sm:$0xff]  }
  0x1a   :  { %3611 = vmatmul.mubr.msk.bf16.vlgmr.msra.gmra.mrb[4].mxu0 %vm587_vm1, %v4284_v19  ;;  %v4039_v4 = vld [vmem:[%s5124_s0 + $0x7c] ss:$144 sps:$4 sm:$0xff]   ;;  %v4052_v13 = vld [vmem:[%s5124_s0 + $0x84] ss:$144 sps:$4 sm:$0xff]   ;;  %v4053_v16 = vld [vmem:[%s5124_s0 + $0x88] ss:$144 sps:$4 sm:$0xff]  }
  0x1b   :  { %3613 = vmatmul.mubr.msk.bf16.vlgmr.msra.gmra.mrb[4].mxu1 %vm587_vm1, %v4284_v19  ;;  %865 = vmatpush1.bf16.msra.mxu0 %v3954_v36  ;;  %v4487_v36 = vsel %vm591_vm0, %v3596_v23, 0  ;;  %v4055_v14 = vld [vmem:[%s5124_s0 + $0x8c] ss:$144 sps:$4 sm:$0xff]   ;;  %v4058_v17 = vld [vmem:[%s5124_s0 + $0x1a4] ss:$144 sps:$4 sm:$0xff]   ;;  %v3605_v23 = vcombine.high %v4505_v40, %v4505_v40 }
  0x1c   :  { %906 = vmatpush1.bf16.msra.mxu1 %v3957_v37  ;;  %866 = vmatprep.subr.bf16.mxu0 %v3962_v38  ;;  %v4490_v37 = vsel %vm591_vm0, %v3598_v24, 0  ;;  %v4493_v38 = vsel %vm591_vm0, %v3600_v25, 0  ;;  %v4061_v18 = vld [vmem:[%s5124_s0 + $0x1ac] ss:$144 sps:$4 sm:$0xff]  }
  0x1d   :  { %907 = vmatprep.subr.bf16.mxu1 %v3965_v39  ;;  %896 = vmatprep.mubr.bf16.mxu0 %v4172_v2  ;;  %v4500_v39 = vld [vmem:[%s5124_s0 + $0x2c0] sm:$0x33] }
  0x1e   :  { %937 = vmatprep.mubr.bf16.mxu1 %v4172_v2  ;;  %2432 = vperm.xlu0 %3921, %v2429_v41  }
  0x1f   :  { %867 = vmatpush1.bf16.msra.mxu0 %v3960_v42  ;;  %v4004_v42 = vld [vmem:[%s5124_s0 + $0x54] ss:$144 sps:$4 sm:$0xff]  }
  0x20   :  { %908 = vmatpush1.bf16.msra.mxu1 %v3963_v43  ;;  %3614 = vmatprep.subr.msk.bf16.mxu0 %vm591_vm0, %v3579_v44  ;;  %v4007_v43 = vld [vmem:[%s5124_s0 + $0x5c] ss:$144 sps:$4 sm:$0xff]   ;;  %v3602_v44 = vcombine.low %v4500_v39, %v4500_v39 }
  0x21   :  { %3616 = vmatprep.subr.msk.bf16.mxu1 %vm591_vm0, %v3581_v45  ;;  %v3604_v45 = vcombine.low %v4505_v40, %v4505_v40 }
  0x22   :  { %v4523_v46 = vsel %vm591_vm0, %v3602_v44, 0 }
  0x23   :  { %869 = vmatpush1.bf16.msra.mxu0 %v617_v49  ;;  %v4526_v47 = vsel %vm591_vm0, %v3604_v45, 0  ;;  %v4005_v49 = vld [vmem:[%s5124_s0 + $0x58] ss:$144 sps:$4 sm:$0xff]  }
  0x24   :  { %910 = vmatpush1.bf16.msra.mxu1 %v623_v50  ;;  %946 = vmatprep.subr.bf16.mxu0 %v3972_v48  ;;  %v4002_v48 = vld [vmem:[%s5124_s0 + $0x50] ss:$144 sps:$4 sm:$0xff]   ;;  %v4010_v50 = vld [vmem:[%s5124_s0 + $0x174] ss:$144 sps:$4 sm:$0xff]  }
  0x25   :  { %987 = vmatprep.subr.bf16.mxu1 %v3975_v51  ;;  %v4013_v51 = vld [vmem:[%s5124_s0 + $0x17c] ss:$144 sps:$4 sm:$0xff]  }
  0x26   :  { %3615 = vmatmul.mubr.msk.bf16.vlgmr.msra.gmra.mrb[8].mxu0 %vm587_vm1, %v4284_v19 }
  0x27   :  { %3617 = vmatmul.mubr.msk.bf16.vlgmr.msra.gmra.mrb[8].mxu1 %vm587_vm1, %v4284_v19  ;;  %947 = vmatpush1.bf16.msra.mxu0 %v3970_v52  ;;  %v4008_v52 = vld [vmem:[%s5124_s0 + $0x170] ss:$144 sps:$4 sm:$0xff]  }
  0x28   :  { %988 = vmatpush1.bf16.msra.mxu1 %v3973_v53  ;;  %948 = vmatprep.subr.bf16.mxu0 %v3978_v54  ;;  %v4011_v53 = vld [vmem:[%s5124_s0 + $0x178] ss:$144 sps:$4 sm:$0xff]   ;;  %v3591_v54 = vcombine.high %v4411_v5, %v4411_v5  ;;  %v4034_v5 = vld [vmem:[%s5124_s0 + $0x70] ss:$144 sps:$4 sm:$0xff]  }
  0x29   :  { %989 = vmatprep.subr.bf16.mxu1 %v3981_v55  ;;  %978 = vmatprep.mubr.bf16.mxu0 %v4172_v2  ;;  %v3593_v55 = vcombine.high %v4416_v6, %v4416_v6  ;;  %v4037_v6 = vld [vmem:[%s5124_s0 + $0x78] ss:$144 sps:$4 sm:$0xff]  }
  0x2a   :  { %1019 = vmatprep.mubr.bf16.mxu1 %v4172_v2 }
  0x2b   :  { %949 = vmatpush1.bf16.msra.mxu0 %v3976_v58  ;;  %v4018_v58 = vld [vmem:[%s5124_s0 + $0x60] ss:$144 sps:$4 sm:$0xff]  }
  0x2c   :  { %990 = vmatpush1.bf16.msra.mxu1 %v3979_v59  ;;  %3618 = vmatprep.subr.msk.bf16.mxu0 %vm591_vm0, %v3583_v60  ;;  %v4021_v59 = vld [vmem:[%s5124_s0 + $0x68] ss:$144 sps:$4 sm:$0xff]   ;;  %v4026_v60 = vld [vmem:[%s5124_s0 + $0x184] ss:$144 sps:$4 sm:$0xff]  }
  0x2d   :  { %3620 = vmatprep.subr.msk.bf16.mxu1 %vm591_vm0, %v3585_v61  ;;  %v4029_v61 = vld [vmem:[%s5124_s0 + $0x18c] ss:$144 sps:$4 sm:$0xff]  }
  0x2f   :  { %951 = vmatpush1.bf16.msra.mxu0 %v629_v7  ;;  %v4042_v7 = vld [vmem:[%s5124_s0 + $0x194] ss:$144 sps:$4 sm:$0xff]  }
  0x30   :  { %992 = vmatpush1.bf16.msra.mxu1 %v635_v8  ;;  %1028 = vmatprep.subr.bf16.mxu0 %v3988_v0  ;;  %v3595_v0 = vcombine.high %v4425_v9, %v4425_v9  ;;  %v4045_v8 = vld [vmem:[%s5124_s0 + $0x19c] ss:$144 sps:$4 sm:$0xff]   ;;  %v4040_v9 = vld [vmem:[%s5124_s0 + $0x190] ss:$144 sps:$4 sm:$0xff]  }
  0x31   :  { %1069 = vmatprep.subr.bf16.mxu1 %v3991_v1  ;;  %v3597_v1 = vcombine.high %v4430_v10, %v4430_v10  ;;  %v4043_v10 = vld [vmem:[%s5124_s0 + $0x198] ss:$144 sps:$4 sm:$0xff]  }
  0x32   :  { %3619 = vmatmul.mubr.msk.bf16.vlgmr.msra.gmra.mrb[12].mxu0 %vm587_vm1, %v4284_v19 }
  0x33   :  { %3621 = vmatmul.mubr.msk.bf16.vlgmr.msra.gmra.mrb[12].mxu1 %vm587_vm1, %v4284_v19  ;;  %1029 = vmatpush1.bf16.msra.mxu0 %v3986_v11  ;;  %v3599_v11 = vcombine.high %v4441_v15, %v4441_v15  ;;  %v4050_v15 = vld [vmem:[%s5124_s0 + $0x80] ss:$144 sps:$4 sm:$0xff]  }
  0x34   :  { %1070 = vmatpush1.bf16.msra.mxu1 %v3989_v12  ;;  %1030 = vmatprep.subr.bf16.mxu0 %v3994_v21  ;;  %v3601_v12 = vcombine.high %v4452_v20, %v4452_v20  ;;  %v4056_v20 = vld [vmem:[%s5124_s0 + $0x1a0] ss:$144 sps:$4 sm:$0xff]   ;;  %v4059_v21 = vld [vmem:[%s5124_s0 + $0x1a8] ss:$144 sps:$4 sm:$0xff]  }
  0x35   :  { %1071 = vmatprep.subr.bf16.mxu1 %v3997_v22  ;;  %1060 = vmatprep.mubr.bf16.mxu0 %v4172_v2  ;;  %v3603_v22 = vcombine.high %v4500_v39, %v4500_v39 }
  0x36   :  { %1101 = vmatprep.mubr.bf16.mxu1 %v4172_v2 }
  0x37   :  { %1031 = vmatpush1.bf16.msra.mxu0 %v3992_v26 }
  0x38   :  { %1072 = vmatpush1.bf16.msra.mxu1 %v3995_v27  ;;  %3622 = vmatprep.subr.msk.bf16.mxu0 %vm591_vm0, %v3587_v28 }
  0x39   :  { %3624 = vmatprep.subr.msk.bf16.mxu1 %vm591_vm0, %v3589_v30 }
  0x3b   :  { %1033 = vmatpush1.bf16.msra.mxu0 %v641_v29 }
  0x3c   :  { %1074 = vmatpush1.bf16.msra.mxu1 %v647_v31  ;;  %1110 = vmatprep.subr.bf16.mxu0 %v4004_v42 }
  0x3d   :  { %1151 = vmatprep.subr.bf16.mxu1 %v4007_v43 }
  0x3e   :  { %3623 = vmatmul.mubr.msk.bf16.vlgmr.msra.gmra.mrb[16].mxu0 %vm587_vm1, %v4284_v19 }
  0x3f   :  { %3625 = vmatmul.mubr.msk.bf16.vlgmr.msra.gmra.mrb[16].mxu1 %vm587_vm1, %v4284_v19  ;;  %1111 = vmatpush1.bf16.msra.mxu0 %v4002_v48 }
  0x40   :  { %1152 = vmatpush1.bf16.msra.mxu1 %v4005_v49  ;;  %1112 = vmatprep.subr.bf16.mxu0 %v4010_v50 }
  0x41   :  { %1153 = vmatprep.subr.bf16.mxu1 %v4013_v51  ;;  %1142 = vmatprep.mubr.bf16.mxu0 %v4172_v2 }
  0x42   :  { %1183 = vmatprep.mubr.bf16.mxu1 %v4172_v2 }
  0x43   :  { %1113 = vmatpush1.bf16.msra.mxu0 %v4008_v52 }
  0x44   :  { %1154 = vmatpush1.bf16.msra.mxu1 %v4011_v53  ;;  %3626 = vmatprep.subr.msk.bf16.mxu0 %vm591_vm0, %v3591_v54 }
  0x45   :  { %3628 = vmatprep.subr.msk.bf16.mxu1 %vm591_vm0, %v3593_v55 }
  0x47   :  { %1115 = vmatpush1.bf16.msra.mxu0 %v653_v32 }
  0x48   :  { %1156 = vmatpush1.bf16.msra.mxu1 %v659_v33  ;;  %1192 = vmatprep.subr.bf16.mxu0 %v4020_v56 }
  0x49   :  { %1233 = vmatprep.subr.bf16.mxu1 %v4023_v57 }
  0x4a   :  { %3627 = vmatmul.mubr.msk.bf16.vlgmr.msra.gmra.mrb[20].mxu0 %vm587_vm1, %v4284_v19 }
  0x4b   :  { %3629 = vmatmul.mubr.msk.bf16.vlgmr.msra.gmra.mrb[20].mxu1 %vm587_vm1, %v4284_v19  ;;  %1193 = vmatpush1.bf16.msra.mxu0 %v4018_v58 }
  0x4c   :  { %1234 = vmatpush1.bf16.msra.mxu1 %v4021_v59  ;;  %1194 = vmatprep.subr.bf16.mxu0 %v4026_v60 }
  0x4d   :  { %1235 = vmatprep.subr.bf16.mxu1 %v4029_v61  ;;  %1224 = vmatprep.mubr.bf16.mxu0 %v4172_v2 }
  0x4e   :  { %1265 = vmatprep.mubr.bf16.mxu1 %v4172_v2 }
  0x4f   :  { %1195 = vmatpush1.bf16.msra.mxu0 %v4024_v62 }
  0x50   :  { %1236 = vmatpush1.bf16.msra.mxu1 %v4027_v63  ;;  %3630 = vmatprep.subr.msk.bf16.mxu0 %vm591_vm0, %v3595_v0 }
  0x51   :  { %3632 = vmatprep.subr.msk.bf16.mxu1 %vm591_vm0, %v3597_v1 }
  0x53   :  { %1197 = vmatpush1.bf16.msra.mxu0 %v4484_v35 }
  0x54   :  { %1238 = vmatpush1.bf16.msra.mxu1 %v4487_v36  ;;  %1274 = vmatprep.subr.bf16.mxu0 %v4036_v3 }
  0x55   :  { %1315 = vmatprep.subr.bf16.mxu1 %v4039_v4 }
  0x56   :  { %3631 = vmatmul.mubr.msk.bf16.vlgmr.msra.gmra.mrb[24].mxu0 %vm587_vm1, %v4284_v19 }
  0x57   :  { %3633 = vmatmul.mubr.msk.bf16.vlgmr.msra.gmra.mrb[24].mxu1 %vm587_vm1, %v4284_v19  ;;  %1275 = vmatpush1.bf16.msra.mxu0 %v4034_v5 }
  0x58   :  { %1316 = vmatpush1.bf16.msra.mxu1 %v4037_v6  ;;  %1276 = vmatprep.subr.bf16.mxu0 %v4042_v7 }
  0x59   :  { %1317 = vmatprep.subr.bf16.mxu1 %v4045_v8  ;;  %1306 = vmatprep.mubr.bf16.mxu0 %v4172_v2 }
  0x5a   :  { %1347 = vmatprep.mubr.bf16.mxu1 %v4172_v2 }
  0x5b   :  { %1277 = vmatpush1.bf16.msra.mxu0 %v4040_v9 }
  0x5c   :  { %1318 = vmatpush1.bf16.msra.mxu1 %v4043_v10  ;;  %3634 = vmatprep.subr.msk.bf16.mxu0 %vm591_vm0, %v3599_v11 }
  0x5d   :  { %3636 = vmatprep.subr.msk.bf16.mxu1 %vm591_vm0, %v3601_v12 }
  0x5f   :  { %1279 = vmatpush1.bf16.msra.mxu0 %v4490_v37 }
  0x60   :  { %1320 = vmatpush1.bf16.msra.mxu1 %v4493_v38  ;;  %1356 = vmatprep.subr.bf16.mxu0 %v4052_v13 }
  0x61   :  { %1397 = vmatprep.subr.bf16.mxu1 %v4055_v14 }
  0x62   :  { %3635 = vmatmul.mubr.msk.bf16.vlgmr.msra.gmra.mrb[28].mxu0 %vm587_vm1, %v4284_v19 }
  0x63   :  { %3637 = vmatmul.mubr.msk.bf16.vlgmr.msra.gmra.mrb[28].mxu1 %vm587_vm1, %v4284_v19  ;;  %1357 = vmatpush1.bf16.msra.mxu0 %v4050_v15 }
  0x64   :  { %1398 = vmatpush1.bf16.msra.mxu1 %v4053_v16  ;;  %1358 = vmatprep.subr.bf16.mxu0 %v4058_v17 }
  0x65   :  { %1399 = vmatprep.subr.bf16.mxu1 %v4061_v18  ;;  %1388 = vmatprep.mubr.bf16.mxu0 %v4172_v2 }
  0x66   :  { %1429 = vmatprep.mubr.bf16.mxu1 %v4172_v2 }
  0x67   :  { %1359 = vmatpush1.bf16.msra.mxu0 %v4056_v20 }
  0x68   :  { %1400 = vmatpush1.bf16.msra.mxu1 %v4059_v21  ;;  %3638 = vmatprep.subr.msk.bf16.mxu0 %vm591_vm0, %v3603_v22 }
  0x69   :  { %3640 = vmatprep.subr.msk.bf16.mxu1 %vm591_vm0, %v3605_v23 }
  0x6b   :  { %1361 = vmatpush1.bf16.msra.mxu0 %v4523_v46 }
  0x6c   :  { %1402 = vmatpush1.bf16.msra.mxu1 %v4526_v47 }
  0x6d   :  { %16 = vsyncpa [#allocation4], 0  ;;  %v3642_v3 = vld [vmem:[%s5127_s3 + $0x2] sm:$0x3]  ;;  %vm1513_vm2 = vcmask 31744   ;;  %vm4176_vm4 = vmmov 0  }
  0x6e   :  { %3639 = vmatmul.mubr.msk.bf16.vlgmr.msra.gmra.mrb[32].mxu0 %vm587_vm1, %v4284_v19  ;;  %s4177_s27 = smov [#allocation3]  }
  0x6f   :  { %3641 = vmatmul.mubr.msk.bf16.vlgmr.msra.gmra.mrb[32].mxu1 %vm587_vm1, %v4284_v19  ;;  %1561 = vmatprep.mubr.bf16.mxu0 %v4172_v2  ;;  %s3490_s28 = sshll.u32 %s4177_s27, 4  ;;  %s3491_s28 = int_to_ptr.vmem [resolvable:$true] %s3490_s28 }
  0x70   :  { %1602 = vmatprep.mubr.bf16.mxu1 %v4172_v2  ;;  %p4153_p1 = scmp.lt.s32.totalorder %s3491_s28, %s3491_s28 }
  0x98   :  { %v4678_v32 = vpop.permute.xlu0 %134 }
  0xe1   :  { %v734_v24 = vpop.f32.mrb[0].mxu0 }
  0xe2   :  { %v775_v25 = vpop.f32.mrb[0].mxu1  ;;  %v736_v26 = vpop.f32.mrb[1].mxu0  ;;  %v735_v33 = vadd.f32 %v734_v24, %v4678_v32 }
  0xe3   :  { %v777_v27 = vpop.f32.mrb[1].mxu1  ;;  %v738_v28 = vpop.f32.mrb[2].mxu0  ;;  %v776_v34 = vadd.f32 %v775_v25, %v4678_v32  ;;  %v737_v19 = vadd.f32 %v736_v26, %v4678_v32 }
  0xe4   :  { %v779_v29 = vpop.f32.mrb[2].mxu1  ;;  %v739_v30 = vpop.f32.mrb[3].mxu0  ;;  %v778_v35 = vadd.f32 %v777_v27, %v4678_v32  ;;  %v1438_v50 = vmax.f32 %v735_v33, 0.0  ;;  %v1510_v27 = vld [vmem:[%s5127_s3] sm:$0x3] }
  0xe5   :  { %v780_v31 = vpop.f32.mrb[3].mxu1  ;;  %v1440_v51 = vmax.f32 %v776_v34, 0.0  ;;  %v1439_v52 = vmax.f32 %v737_v19, 0.0 }
  0xe6   :  { %v1441_v53 = vmax.f32 %v778_v35, 0.0  ;;  %v1474_v62 = vpack.c.bf16 %v1438_v50, %v1438_v50 }
  0xe7   :  { %v1475_v63 = vpack.c.bf16 %v1439_v52, %v1439_v52  ;;  %v1476_v1 = vpack.c.bf16 %v1440_v51, %v1440_v51 }
  0xe8   :  { %v1477_v0 = vpack.c.bf16 %v1441_v53, %v1441_v53  ;;  %v1615_v6 = vsel %vm591_vm0, %v1474_v62, 0  ;;  %v3656_v53 = vld [vmem:[%s5127_s3 + $0x6] sm:$0x3] }
  0xe9   :  { %v1621_v7 = vsel %vm591_vm0, %v1476_v1, 0 }
  0xed   :  { %v816_v36 = vpop.f32.mrb[4].mxu0 }
  0xee   :  { %v857_v37 = vpop.f32.mrb[4].mxu1  ;;  %v817_v38 = vadd.f32 %v816_v36, %v4678_v32  ;;  %v818_v40 = vpop.f32.mrb[5].mxu0 }
  0xef   :  { %v858_v39 = vadd.f32 %v857_v37, %v4678_v32  ;;  %v859_v41 = vpop.f32.mrb[5].mxu1  ;;  %v819_v42 = vadd.f32 %v818_v40, %v4678_v32  ;;  %v820_v44 = vpop.f32.mrb[6].mxu0  ;;  %v3651_v40 = vld [vmem:[%s5127_s3 + $0x4] sm:$0x3] }
  0xf0   :  { %v860_v43 = vadd.f32 %v859_v41, %v4678_v32  ;;  %v861_v45 = vpop.f32.mrb[6].mxu1  ;;  %v1442_v46 = vmax.f32 %v817_v38, 0.0  ;;  %v821_v48 = vpop.f32.mrb[7].mxu0 }
  0xf1   :  { %v1444_v47 = vmax.f32 %v858_v39, 0.0  ;;  %v862_v49 = vpop.f32.mrb[7].mxu1  ;;  %v1443_v54 = vmax.f32 %v819_v42, 0.0 }
  0xf2   :  { %v1445_v55 = vmax.f32 %v860_v43, 0.0  ;;  %v1478_v56 = vpack.c.bf16 %v1442_v46, %v1442_v46 }
  0xf3   :  { %v1480_v57 = vpack.c.bf16 %v1444_v47, %v1444_v47  ;;  %v1479_v58 = vpack.c.bf16 %v1443_v54, %v1443_v54 }
  0xf4   :  { %v1481_v59 = vpack.c.bf16 %v1445_v55, %v1445_v55  ;;  %v1518_v60 = vsel %vm591_vm0, %v1478_v56, 0 }
  0xf5   :  { %v1524_v61 = vsel %vm591_vm0, %v1480_v57, 0  ;;  %3643 = vmatprep.subr.msk.bf16.mxu0 %vm591_vm0, %v1479_v58 }
  0xf6   :  { %3645 = vmatprep.subr.msk.bf16.mxu1 %vm591_vm0, %v1481_v59  ;;  %1530 = vmatpush1.bf16.msra.mxu0 %v1518_v60 }
  0xf7   :  { %1571 = vmatpush1.bf16.msra.mxu1 %v1524_v61  ;;  %3647 = vmatprep.subr.msk.bf16.mxu0 %vm591_vm0, %v1475_v63 }
  0xf8   :  { %3649 = vmatprep.subr.msk.bf16.mxu1 %vm591_vm0, %v1477_v0 }
  0xf9   :  { %v898_v4 = vpop.f32.mrb[8].mxu0  ;;  %3644 = vmatmul.mubr.msk.bf16.vlgmr.msra.gmra.mrb[36].mxu0 %vm1513_vm2, %v3642_v3 }
  0xfa   :  { %v939_v5 = vpop.f32.mrb[8].mxu1  ;;  %3646 = vmatmul.mubr.msk.bf16.vlgmr.msra.gmra.mrb[36].mxu1 %vm1513_vm2, %v3642_v3  ;;  %v899_v8 = vadd.f32 %v898_v4, %v4678_v32  ;;  %v900_v10 = vpop.f32.mrb[9].mxu0  ;;  %1627 = vmatpush1.bf16.msra.mxu0 %v1615_v6 }
  0xfb   :  { %v940_v9 = vadd.f32 %v939_v5, %v4678_v32  ;;  %v941_v11 = vpop.f32.mrb[9].mxu1  ;;  %1668 = vmatpush1.bf16.msra.mxu1 %v1621_v7  ;;  %v901_v12 = vadd.f32 %v900_v10, %v4678_v32  ;;  %v902_v14 = vpop.f32.mrb[10].mxu0  ;;  %1658 = vmatprep.mubr.bf16.mxu0 %v4172_v2 }
  0xfc   :  { %v942_v13 = vadd.f32 %v941_v11, %v4678_v32  ;;  %v943_v15 = vpop.f32.mrb[10].mxu1  ;;  %1699 = vmatprep.mubr.bf16.mxu1 %v4172_v2  ;;  %v1446_v16 = vmax.f32 %v899_v8, 0.0  ;;  %v903_v18 = vpop.f32.mrb[11].mxu0 }
  0xfd   :  { %v1448_v17 = vmax.f32 %v940_v9, 0.0  ;;  %v944_v20 = vpop.f32.mrb[11].mxu1  ;;  %v1447_v21 = vmax.f32 %v901_v12, 0.0 }
  0xfe   :  { %v1449_v22 = vmax.f32 %v942_v13, 0.0  ;;  %v1482_v23 = vpack.c.bf16 %v1446_v16, %v1446_v16  ;;  %v3661_v13 = vld [vmem:[%s5127_s3 + $0x8] sm:$0x3] }
  0xff   :  { %v1484_v24 = vpack.c.bf16 %v1448_v17, %v1448_v17  ;;  %v1483_v25 = vpack.c.bf16 %v1447_v21, %v1447_v21 }
 0x100   :  { %v1485_v26 = vpack.c.bf16 %v1449_v22, %v1449_v22  ;;  %v1714_v28 = vsel %vm591_vm0, %v1482_v23, 0 }
 0x101   :  { %v1720_v29 = vsel %vm591_vm0, %v1484_v24, 0  ;;  %3652 = vmatprep.subr.msk.bf16.mxu0 %vm591_vm0, %v1483_v25  ;;  %3648 = vmatmul.mubr.msk.bf16.vlgmr.msra.gmra.mrb[40].mxu0 %vm1513_vm2, %v1510_v27 }
 0x102   :  { %3654 = vmatprep.subr.msk.bf16.mxu1 %vm591_vm0, %v1485_v26  ;;  %3650 = vmatmul.mubr.msk.bf16.vlgmr.msra.gmra.mrb[40].mxu1 %vm1513_vm2, %v1510_v27 }
 0x103   :  { %1726 = vmatpush1.bf16.msra.mxu0 %v1714_v28  ;;  %1767 = vmatpush1.bf16.msra.mxu1 %v1720_v29 }
 0x104   :  { %1757 = vmatprep.mubr.bf16.mxu0 %v4172_v2  ;;  %1798 = vmatprep.mubr.bf16.mxu1 %v4172_v2 }
 0x105   :  { %v980_v30 = vpop.f32.mrb[12].mxu0 }
 0x106   :  { %v1021_v31 = vpop.f32.mrb[12].mxu1  ;;  %v981_v33 = vadd.f32 %v980_v30, %v4678_v32  ;;  %v982_v19 = vpop.f32.mrb[13].mxu0 }
 0x107   :  { %v1022_v34 = vadd.f32 %v1021_v31, %v4678_v32  ;;  %v1023_v35 = vpop.f32.mrb[13].mxu1  ;;  %v983_v36 = vadd.f32 %v982_v19, %v4678_v32  ;;  %v984_v38 = vpop.f32.mrb[14].mxu0 }
 0x108   :  { %v1024_v37 = vadd.f32 %v1023_v35, %v4678_v32  ;;  %v1025_v39 = vpop.f32.mrb[14].mxu1  ;;  %v1450_v41 = vmax.f32 %v981_v33, 0.0  ;;  %v985_v43 = vpop.f32.mrb[15].mxu0 }
 0x109   :  { %v1452_v42 = vmax.f32 %v1022_v34, 0.0  ;;  %v1026_v44 = vpop.f32.mrb[15].mxu1  ;;  %v1451_v45 = vmax.f32 %v983_v36, 0.0  ;;  %3653 = vmatmul.mubr.msk.bf16.vlgmr.msra.gmra.mrb[44].mxu0 %vm1513_vm2, %v3651_v40 }
 0x10a   :  { %v1453_v46 = vmax.f32 %v1024_v37, 0.0  ;;  %v1486_v47 = vpack.c.bf16 %v1450_v41, %v1450_v41  ;;  %3655 = vmatmul.mubr.msk.bf16.vlgmr.msra.gmra.mrb[44].mxu1 %vm1513_vm2, %v3651_v40  ;;  %1860 = vmatprep.mubr.bf16.mxu0 %v4172_v2  ;;  %v3666_v37 = vld [vmem:[%s5127_s3 + $0xa] sm:$0x3] }
 0x10b   :  { %v1488_v48 = vpack.c.bf16 %v1452_v42, %v1452_v42  ;;  %v1487_v49 = vpack.c.bf16 %v1451_v45, %v1451_v45  ;;  %1901 = vmatprep.mubr.bf16.mxu1 %v4172_v2 }
 0x10c   :  { %v1489_v50 = vpack.c.bf16 %v1453_v46, %v1453_v46  ;;  %v1817_v51 = vsel %vm591_vm0, %v1486_v47, 0 }
 0x10d   :  { %v1823_v52 = vsel %vm591_vm0, %v1488_v48, 0  ;;  %3657 = vmatprep.subr.msk.bf16.mxu0 %vm591_vm0, %v1487_v49 }
 0x10e   :  { %3659 = vmatprep.subr.msk.bf16.mxu1 %vm591_vm0, %v1489_v50  ;;  %1829 = vmatpush1.bf16.msra.mxu0 %v1817_v51 }
 0x10f   :  { %1870 = vmatpush1.bf16.msra.mxu1 %v1823_v52 }
 0x111   :  { %v1062_v54 = vpop.f32.mrb[16].mxu0  ;;  %3658 = vmatmul.mubr.msk.bf16.vlgmr.msra.gmra.mrb[48].mxu0 %vm1513_vm2, %v3656_v53 }
 0x112   :  { %v1103_v55 = vpop.f32.mrb[16].mxu1  ;;  %v1063_v56 = vadd.f32 %v1062_v54, %v4678_v32  ;;  %v1064_v58 = vpop.f32.mrb[17].mxu0  ;;  %3660 = vmatmul.mubr.msk.bf16.vlgmr.msra.gmra.mrb[48].mxu1 %vm1513_vm2, %v3656_v53  ;;  %1963 = vmatprep.mubr.bf16.mxu0 %v4172_v2 }
 0x113   :  { %v1104_v57 = vadd.f32 %v1103_v55, %v4678_v32  ;;  %v1105_v59 = vpop.f32.mrb[17].mxu1  ;;  %v1065_v60 = vadd.f32 %v1064_v58, %v4678_v32  ;;  %v1066_v62 = vpop.f32.mrb[18].mxu0  ;;  %2004 = vmatprep.mubr.bf16.mxu1 %v4172_v2 }
 0x114   :  { %v1106_v61 = vadd.f32 %v1105_v59, %v4678_v32  ;;  %v1107_v63 = vpop.f32.mrb[18].mxu1  ;;  %v1454_v0 = vmax.f32 %v1063_v56, 0.0  ;;  %v1067_v3 = vpop.f32.mrb[19].mxu0 }
 0x115   :  { %v1456_v1 = vmax.f32 %v1104_v57, 0.0  ;;  %v1108_v4 = vpop.f32.mrb[19].mxu1  ;;  %v1455_v5 = vmax.f32 %v1065_v60, 0.0  ;;  %v3671_v60 = vld [vmem:[%s5127_s3 + $0xc] sm:$0x3] }
 0x116   :  { %v1457_v6 = vmax.f32 %v1106_v61, 0.0  ;;  %v1490_v7 = vpack.c.bf16 %v1454_v0, %v1454_v0 }
 0x117   :  { %v1492_v8 = vpack.c.bf16 %v1456_v1, %v1456_v1  ;;  %v1491_v9 = vpack.c.bf16 %v1455_v5, %v1455_v5 }
 0x118   :  { %v1493_v10 = vpack.c.bf16 %v1457_v6, %v1457_v6  ;;  %v1920_v11 = vsel %vm591_vm0, %v1490_v7, 0 }
 0x119   :  { %v1926_v12 = vsel %vm591_vm0, %v1492_v8, 0  ;;  %3662 = vmatprep.subr.msk.bf16.mxu0 %vm591_vm0, %v1491_v9 }
 0x11a   :  { %3664 = vmatprep.subr.msk.bf16.mxu1 %vm591_vm0, %v1493_v10  ;;  %1932 = vmatpush1.bf16.msra.mxu0 %v1920_v11 }
 0x11b   :  { %1973 = vmatpush1.bf16.msra.mxu1 %v1926_v12 }
 0x11d   :  { %v1144_v14 = vpop.f32.mrb[20].mxu0  ;;  %3663 = vmatmul.mubr.msk.bf16.vlgmr.msra.gmra.mrb[52].mxu0 %vm1513_vm2, %v3661_v13 }
 0x11e   :  { %v1185_v15 = vpop.f32.mrb[20].mxu1  ;;  %3665 = vmatmul.mubr.msk.bf16.vlgmr.msra.gmra.mrb[52].mxu1 %vm1513_vm2, %v3661_v13  ;;  %v1145_v16 = vadd.f32 %v1144_v14, %v4678_v32  ;;  %v1146_v18 = vpop.f32.mrb[21].mxu0  ;;  %2066 = vmatprep.mubr.bf16.mxu0 %v4172_v2 }
 0x11f   :  { %v1186_v17 = vadd.f32 %v1185_v15, %v4678_v32  ;;  %v1187_v20 = vpop.f32.mrb[21].mxu1  ;;  %2107 = vmatprep.mubr.bf16.mxu1 %v4172_v2  ;;  %v1147_v21 = vadd.f32 %v1146_v18, %v4678_v32  ;;  %v1148_v23 = vpop.f32.mrb[22].mxu0 }
 0x120   :  { %v1188_v22 = vadd.f32 %v1187_v20, %v4678_v32  ;;  %v1189_v24 = vpop.f32.mrb[22].mxu1  ;;  %v1458_v25 = vmax.f32 %v1145_v16, 0.0  ;;  %v1149_v27 = vpop.f32.mrb[23].mxu0 }
 0x121   :  { %v1460_v26 = vmax.f32 %v1186_v17, 0.0  ;;  %v1190_v28 = vpop.f32.mrb[23].mxu1  ;;  %v1459_v29 = vmax.f32 %v1147_v21, 0.0  ;;  %v3676_v21 = vld [vmem:[%s5127_s3 + $0xe] sm:$0x3] }
 0x122   :  { %v1461_v30 = vmax.f32 %v1188_v22, 0.0  ;;  %v1494_v31 = vpack.c.bf16 %v1458_v25, %v1458_v25 }
 0x123   :  { %v1496_v33 = vpack.c.bf16 %v1460_v26, %v1460_v26  ;;  %v1495_v34 = vpack.c.bf16 %v1459_v29, %v1459_v29 }
 0x124   :  { %v1497_v19 = vpack.c.bf16 %v1461_v30, %v1461_v30  ;;  %v2023_v35 = vsel %vm591_vm0, %v1494_v31, 0 }
 0x125   :  { %v2029_v36 = vsel %vm591_vm0, %v1496_v33, 0  ;;  %3667 = vmatprep.subr.msk.bf16.mxu0 %vm591_vm0, %v1495_v34 }
 0x126   :  { %3669 = vmatprep.subr.msk.bf16.mxu1 %vm591_vm0, %v1497_v19  ;;  %2035 = vmatpush1.bf16.msra.mxu0 %v2023_v35 }
 0x127   :  { %2076 = vmatpush1.bf16.msra.mxu1 %v2029_v36 }
 0x129   :  { %v1226_v38 = vpop.f32.mrb[24].mxu0  ;;  %3668 = vmatmul.mubr.msk.bf16.vlgmr.msra.gmra.mrb[56].mxu0 %vm1513_vm2, %v3666_v37 }
 0x12a   :  { %v1267_v39 = vpop.f32.mrb[24].mxu1  ;;  %3670 = vmatmul.mubr.msk.bf16.vlgmr.msra.gmra.mrb[56].mxu1 %vm1513_vm2, %v3666_v37  ;;  %v1227_v40 = vadd.f32 %v1226_v38, %v4678_v32  ;;  %v1228_v42 = vpop.f32.mrb[25].mxu0  ;;  %2169 = vmatprep.mubr.bf16.mxu0 %v4172_v2 }
 0x12b   :  { %v1268_v41 = vadd.f32 %v1267_v39, %v4678_v32  ;;  %v1269_v43 = vpop.f32.mrb[25].mxu1  ;;  %2210 = vmatprep.mubr.bf16.mxu1 %v4172_v2  ;;  %v1229_v44 = vadd.f32 %v1228_v42, %v4678_v32  ;;  %v1230_v46 = vpop.f32.mrb[26].mxu0 }
 0x12c   :  { %v1270_v45 = vadd.f32 %v1269_v43, %v4678_v32  ;;  %v1271_v47 = vpop.f32.mrb[26].mxu1  ;;  %v1462_v48 = vmax.f32 %v1227_v40, 0.0  ;;  %v1231_v50 = vpop.f32.mrb[27].mxu0  ;;  %v4066_v43 = vld [vmem:[%s5129_s5 + $0x40] sm:$0xff]  }
 0x12d   :  { %v1464_v49 = vmax.f32 %v1268_v41, 0.0  ;;  %v1272_v51 = vpop.f32.mrb[27].mxu1  ;;  %v1463_v52 = vmax.f32 %v1229_v44, 0.0  ;;  %v4067_v44 = vld [vmem:[%s5129_s5] sm:$0xff]   ;;  %v4070_v47 = vld [vmem:[%s5129_s5 + $0x48] sm:$0xff]  }
 0x12e   :  { %v1465_v53 = vmax.f32 %v1270_v45, 0.0  ;;  %v1498_v54 = vpack.c.bf16 %v1462_v48, %v1462_v48  ;;  %v4068_v45 = vld [vmem:[%s5129_s5 + $0xc0] sm:$0xff]   ;;  %v4071_v48 = vld [vmem:[%s5129_s5 + $0x8] sm:$0xff]   ;;  %v4074_v51 = vld [vmem:[%s5129_s5 + $0x50] sm:$0xff]  }
 0x12f   :  { %v1500_v55 = vpack.c.bf16 %v1464_v49, %v1464_v49  ;;  %v1499_v56 = vpack.c.bf16 %v1463_v52, %v1463_v52  ;;  %v4069_v46 = vld [vmem:[%s5129_s5 + $0x80] sm:$0xff]   ;;  %v4072_v49 = vld [vmem:[%s5129_s5 + $0xc8] sm:$0xff]   ;;  %v4075_v52 = vld [vmem:[%s5129_s5 + $0x10] sm:$0xff]  }
 0x130   :  { %v1501_v57 = vpack.c.bf16 %v1465_v53, %v1465_v53  ;;  %v2126_v58 = vsel %vm591_vm0, %v1498_v54, 0  ;;  %v4073_v50 = vld [vmem:[%s5129_s5 + $0x88] sm:$0xff]   ;;  %v4076_v53 = vld [vmem:[%s5129_s5 + $0xd0] sm:$0xff]  }
 0x131   :  { %v2132_v59 = vsel %vm591_vm0, %v1500_v55, 0  ;;  %3672 = vmatprep.subr.msk.bf16.mxu0 %vm591_vm0, %v1499_v56  ;;  %v4077_v54 = vld [vmem:[%s5129_s5 + $0x90] sm:$0xff]   ;;  %v4078_v55 = vld [vmem:[%s5129_s5 + $0x58] sm:$0xff]  }
 0x132   :  { %3674 = vmatprep.subr.msk.bf16.mxu1 %vm591_vm0, %v1501_v57  ;;  %2138 = vmatpush1.bf16.msra.mxu0 %v2126_v58  ;;  %v4079_v56 = vld [vmem:[%s5129_s5 + $0x18] sm:$0xff]  }
 0x133   :  { %2179 = vmatpush1.bf16.msra.mxu1 %v2132_v59  ;;  %v4080_v57 = vld [vmem:[%s5129_s5 + $0xd8] sm:$0xff]   ;;  %v4082_v59 = vld [vmem:[%s5129_s5 + $0x60] sm:$0xff]  }
 0x134   :  { %v4081_v58 = vld [vmem:[%s5129_s5 + $0x98] sm:$0xff]  }
 0x135   :  { %v1308_v61 = vpop.f32.mrb[28].mxu0  ;;  %3673 = vmatmul.mubr.msk.bf16.vlgmr.msra.gmra.mrb[60].mxu0 %vm1513_vm2, %v3671_v60 }
 0x136   :  { %v1349_v62 = vpop.f32.mrb[28].mxu1  ;;  %3675 = vmatmul.mubr.msk.bf16.vlgmr.msra.gmra.mrb[60].mxu1 %vm1513_vm2, %v3671_v60  ;;  %v1309_v63 = vadd.f32 %v1308_v61, %v4678_v32  ;;  %v1310_v1 = vpop.f32.mrb[29].mxu0  ;;  %2272 = vmatprep.mubr.bf16.mxu0 %v4172_v2  ;;  %v4083_v60 = vld [vmem:[%s5129_s5 + $0x20] sm:$0xff]  }
 0x137   :  { %v1350_v0 = vadd.f32 %v1349_v62, %v4678_v32  ;;  %v1351_v3 = vpop.f32.mrb[29].mxu1  ;;  %2313 = vmatprep.mubr.bf16.mxu1 %v4172_v2  ;;  %v1311_v4 = vadd.f32 %v1310_v1, %v4678_v32  ;;  %v1312_v6 = vpop.f32.mrb[30].mxu0  ;;  %v4084_v61 = vld [vmem:[%s5129_s5 + $0xe0] sm:$0xff]   ;;  %v4088_v1 = vld [vmem:[%s5129_s5 + $0xe8] sm:$0xff]  }
 0x138   :  { %v1352_v5 = vadd.f32 %v1351_v3, %v4678_v32  ;;  %v1353_v7 = vpop.f32.mrb[30].mxu1  ;;  %v1466_v8 = vmax.f32 %v1309_v63, 0.0  ;;  %v1313_v10 = vpop.f32.mrb[31].mxu0  ;;  %v4085_v62 = vld [vmem:[%s5129_s5 + $0xa0] sm:$0xff]   ;;  %v4086_v63 = vld [vmem:[%s5129_s5 + $0x68] sm:$0xff]   ;;  %v4091_v6 = vld [vmem:[%s5129_s5 + $0x30] sm:$0xff]  }
 0x139   :  { %v1468_v9 = vmax.f32 %v1350_v0, 0.0  ;;  %v1354_v11 = vpop.f32.mrb[31].mxu1  ;;  %v1467_v12 = vmax.f32 %v1311_v4, 0.0  ;;  %v4087_v0 = vld [vmem:[%s5129_s5 + $0x28] sm:$0xff]   ;;  %v4090_v4 = vld [vmem:[%s5129_s5 + $0x70] sm:$0xff]   ;;  %v4094_v7 = vld [vmem:[%s5129_s5 + $0x78] sm:$0xff]  }
 0x13a   :  { %v1469_v13 = vmax.f32 %v1352_v5, 0.0  ;;  %v1502_v14 = vpack.c.bf16 %v1466_v8, %v1466_v8  ;;  %v4089_v3 = vld [vmem:[%s5129_s5 + $0xa8] sm:$0xff]   ;;  %v4092_v5 = vld [vmem:[%s5129_s5 + $0xf0] sm:$0xff]   ;;  %v4095_v10 = vld [vmem:[%s5129_s5 + $0x38] sm:$0xff]  }
 0x13b   :  { %v1504_v15 = vpack.c.bf16 %v1468_v9, %v1468_v9  ;;  %v1503_v16 = vpack.c.bf16 %v1467_v12, %v1467_v12  ;;  %v4093_v8 = vld [vmem:[%s5129_s5 + $0xb0] sm:$0xff]   ;;  %v4096_v9 = vld [vmem:[%s5129_s5 + $0xf8] sm:$0xff]   ;;  %v4098_v12 = vld [vmem:[%s5129_s5 + $0x140] sm:$0xff]  }
 0x13c   :  { %v1505_v17 = vpack.c.bf16 %v1469_v13, %v1469_v13  ;;  %v2229_v18 = vsel %vm591_vm0, %v1502_v14, 0  ;;  %v4097_v11 = vld [vmem:[%s5129_s5 + $0xb8] sm:$0xff]   ;;  %v4101_v13 = vld [vmem:[%s5129_s5 + $0x1c0] sm:$0xff]  }
 0x13d   :  { %v2235_v20 = vsel %vm591_vm0, %v1504_v15, 0  ;;  %3677 = vmatprep.subr.msk.bf16.mxu0 %vm591_vm0, %v1503_v16 }
 0x13e   :  { %3679 = vmatprep.subr.msk.bf16.mxu1 %vm591_vm0, %v1505_v17  ;;  %2241 = vmatpush1.bf16.msra.mxu0 %v2229_v18 }
 0x13f   :  { %2282 = vmatpush1.bf16.msra.mxu1 %v2235_v20 }
 0x141   :  { %v1390_v22 = vpop.f32.mrb[32].mxu0  ;;  %3678 = vmatmul.mubr.msk.bf16.vlgmr.msra.gmra.mrb[64].mxu0 %vm1513_vm2, %v3676_v21 }
 0x142   :  { %v1431_v23 = vpop.f32.mrb[32].mxu1  ;;  %3680 = vmatmul.mubr.msk.bf16.vlgmr.msra.gmra.mrb[64].mxu1 %vm1513_vm2, %v3676_v21  ;;  %v1391_v24 = vadd.f32 %v1390_v22, %v4678_v32  ;;  %v1392_v26 = vpop.f32.mrb[33].mxu0  ;;  %2375 = vmatprep.mubr.bf16.mxu0 %v4172_v2 }
 0x143   :  { %v1432_v25 = vadd.f32 %v1431_v23, %v4678_v32  ;;  %v1433_v27 = vpop.f32.mrb[33].mxu1  ;;  %2416 = vmatprep.mubr.bf16.mxu1 %v4172_v2  ;;  %v1393_v28 = vadd.f32 %v1392_v26, %v4678_v32  ;;  %v1394_v30 = vpop.f32.mrb[34].mxu0 }
 0x144   :  { %v1434_v29 = vadd.f32 %v1433_v27, %v4678_v32  ;;  %v1435_v31 = vpop.f32.mrb[34].mxu1  ;;  %v1470_v33 = vmax.f32 %v1391_v24, 0.0  ;;  %v1395_v19 = vpop.f32.mrb[35].mxu0  ;;  %v3681_v32 = vld [vmem:[%s5127_s3 + $0x10] sm:$0x3] }
 0x145   :  { %v1472_v34 = vmax.f32 %v1432_v25, 0.0  ;;  %v1436_v35 = vpop.f32.mrb[35].mxu1  ;;  %v1471_v36 = vmax.f32 %v1393_v28, 0.0 }
 0x146   :  { %v1473_v37 = vmax.f32 %v1434_v29, 0.0  ;;  %v1506_v38 = vpack.c.bf16 %v1470_v33, %v1470_v33 }
 0x147   :  { %v1508_v39 = vpack.c.bf16 %v1472_v34, %v1472_v34  ;;  %v1507_v40 = vpack.c.bf16 %v1471_v36, %v1471_v36 }
 0x148   :  { %v1509_v41 = vpack.c.bf16 %v1473_v37, %v1473_v37  ;;  %v2332_v42 = vsel %vm591_vm0, %v1506_v38, 0 }
 0x149   :  { %v2338_v2 = vsel %vm591_vm0, %v1508_v39, 0  ;;  %3682 = vmatprep.subr.msk.bf16.mxu0 %vm591_vm0, %v1507_v40 }
 0x14a   :  { %3684 = vmatprep.subr.msk.bf16.mxu1 %vm591_vm0, %v1509_v41  ;;  %2344 = vmatpush1.bf16.msra.mxu0 %v2332_v42 }
 0x14b   :  { %2385 = vmatpush1.bf16.msra.mxu1 %v2338_v2  ;;  %3769 = vmatprep.subr.bf16.mxu0 %v4066_v43 }
 0x14c   :  { %3791 = vmatprep.subr.bf16.mxu1 %v4068_v45 }
 0x14d   :  { %3683 = vmatmul.mubr.msk.bf16.vlgmr.msra.gmra.mrb[68].mxu0 %vm1513_vm2, %v3681_v32 }
 0x14e   :  { %3685 = vmatmul.mubr.msk.bf16.vlgmr.msra.gmra.mrb[68].mxu1 %vm1513_vm2, %v3681_v32  ;;  %3770 = vmatpush3.bf16.msra.mxu0 %v4067_v44 }
 0x14f   :  { %3792 = vmatpush3.bf16.msra.mxu1 %v4069_v46  ;;  %3771 = vmatprep.subr.bf16.mxu0 %v4070_v47 }
 0x150   :  { %3793 = vmatprep.subr.bf16.mxu1 %v4072_v49 }
 0x152   :  { %3772 = vmatpush3.bf16.msra.mxu0 %v4071_v48 }
 0x153   :  { %3794 = vmatpush3.bf16.msra.mxu1 %v4073_v50  ;;  %3773 = vmatprep.subr.bf16.mxu0 %v4074_v51 }
 0x154   :  { %3795 = vmatprep.subr.bf16.mxu1 %v4076_v53 }
 0x156   :  { %3774 = vmatpush3.bf16.msra.mxu0 %v4075_v52 }
 0x157   :  { %3796 = vmatpush3.bf16.msra.mxu1 %v4077_v54  ;;  %3775 = vmatprep.subr.bf16.mxu0 %v4078_v55 }
 0x158   :  { %3797 = vmatprep.subr.bf16.mxu1 %v4080_v57 }
 0x15a   :  { %3776 = vmatpush3.bf16.msra.mxu0 %v4079_v56 }
 0x15b   :  { %3798 = vmatpush3.bf16.msra.mxu1 %v4081_v58  ;;  %3777 = vmatprep.subr.bf16.mxu0 %v4082_v59 }
 0x15c   :  { %3799 = vmatprep.subr.bf16.mxu1 %v4084_v61 }
 0x15e   :  { %3778 = vmatpush3.bf16.msra.mxu0 %v4083_v60 }
 0x15f   :  { %3800 = vmatpush3.bf16.msra.mxu1 %v4085_v62  ;;  %3779 = vmatprep.subr.bf16.mxu0 %v4086_v63 }
 0x160   :  { %3801 = vmatprep.subr.bf16.mxu1 %v4088_v1 }
 0x162   :  { %3780 = vmatpush3.bf16.msra.mxu0 %v4087_v0 }
 0x163   :  { %3781 = vmatprep.subr.bf16.mxu0 %v4090_v4  ;;  %3802 = vmatpush3.bf16.msra.mxu1 %v4089_v3 }
 0x164   :  { %3803 = vmatprep.subr.bf16.mxu1 %v4092_v5 }
 0x166   :  { %3782 = vmatpush3.bf16.msra.mxu0 %v4091_v6 }
 0x167   :  { %3783 = vmatprep.subr.bf16.mxu0 %v4094_v7  ;;  %3804 = vmatpush3.bf16.msra.mxu1 %v4093_v8 }
 0x168   :  { %3805 = vmatprep.subr.bf16.mxu1 %v4096_v9 }
 0x16a   :  { %3784 = vmatpush3.bf16.msra.mxu0 %v4095_v10 }
 0x16b   :  { %3806 = vmatpush3.bf16.msra.mxu1 %v4097_v11  ;;  %3813 = vmatprep.subr.bf16.mxu0 %v4098_v12 }
 0x16c   :  { %3835 = vmatprep.subr.bf16.mxu1 %v4101_v13 }
 0x1cc   :  { %v1563_v14 = vpop.f32.mrb[36].mxu0 }
 0x1cd   :  { %v1604_v15 = vpop.f32.mrb[36].mxu1  ;;  %v1565_v16 = vpop.f32.mrb[37].mxu0 }
 0x1ce   :  { %v1606_v17 = vpop.f32.mrb[37].mxu1  ;;  %v1567_v18 = vpop.f32.mrb[38].mxu0 }
 0x1cf   :  { %v1608_v20 = vpop.f32.mrb[38].mxu1  ;;  %v1568_v21 = vpop.f32.mrb[39].mxu0 }
 0x1d0   :  { %v1609_v22 = vpop.f32.mrb[39].mxu1 }
 0x1d4   :  { %v1660_v23 = vpop.f32.mrb[40].mxu0 }
 0x1d5   :  { %v1701_v24 = vpop.f32.mrb[40].mxu1  ;;  %v1661_v25 = vadd.f32 %v1660_v23, %v1563_v14  ;;  %v1662_v27 = vpop.f32.mrb[41].mxu0 }
 0x1d6   :  { %v1702_v26 = vadd.f32 %v1701_v24, %v1604_v15  ;;  %v1703_v28 = vpop.f32.mrb[41].mxu1  ;;  %v1663_v29 = vadd.f32 %v1662_v27, %v1565_v16  ;;  %v1664_v31 = vpop.f32.mrb[42].mxu0 }
 0x1d7   :  { %v1704_v30 = vadd.f32 %v1703_v28, %v1606_v17  ;;  %v1705_v33 = vpop.f32.mrb[42].mxu1  ;;  %v1665_v34 = vpop.f32.mrb[43].mxu0 }
 0x1d8   :  { %v1706_v19 = vpop.f32.mrb[43].mxu1 }
 0x1dc   :  { %v1759_v35 = vpop.f32.mrb[44].mxu0 }
 0x1dd   :  { %v1800_v36 = vpop.f32.mrb[44].mxu1  ;;  %v1807_v37 = vadd.f32 %v1759_v35, %v1661_v25  ;;  %v1761_v39 = vpop.f32.mrb[45].mxu0 }
 0x1de   :  { %v1809_v38 = vadd.f32 %v1800_v36, %v1702_v26  ;;  %v1802_v40 = vpop.f32.mrb[45].mxu1  ;;  %v1808_v41 = vadd.f32 %v1761_v39, %v1663_v29  ;;  %v1763_v2 = vpop.f32.mrb[46].mxu0 }
 0x1df   :  { %v1810_v42 = vadd.f32 %v1802_v40, %v1704_v30  ;;  %v1804_v32 = vpop.f32.mrb[46].mxu1  ;;  %v1764_v43 = vpop.f32.mrb[47].mxu0  ;;  %v4173_v2 = vmov 1966171168  }
 0x1e0   :  { %v1805_v44 = vpop.f32.mrb[47].mxu1  ;;  %v2447_v32 = vunpack.c.l.s4 %v4173_v2  ;;  %v2449_v43 = vlaneseq }
 0x1e1   :  { %v2433_v44 = vpop.permute.xlu0 %2432 }
 0x1e2   :  { %vm4915_vm3 = vcmp.lt.s32.totalorder %v2449_v43, 256 }
 0x1e4   :  { %v1862_v45 = vpop.f32.mrb[48].mxu0 }
 0x1e5   :  { %v1903_v46 = vpop.f32.mrb[48].mxu1  ;;  %v1910_v47 = vadd.f32 %v1862_v45, %v1807_v37  ;;  %v1864_v49 = vpop.f32.mrb[49].mxu0 }
 0x1e6   :  { %v1912_v48 = vadd.f32 %v1903_v46, %v1809_v38  ;;  %v1905_v50 = vpop.f32.mrb[49].mxu1  ;;  %v1911_v51 = vadd.f32 %v1864_v49, %v1808_v41  ;;  %v1866_v53 = vpop.f32.mrb[50].mxu0 }
 0x1e7   :  { %v1913_v52 = vadd.f32 %v1905_v50, %v1810_v42  ;;  %v1907_v54 = vpop.f32.mrb[50].mxu1  ;;  %v1867_v55 = vpop.f32.mrb[51].mxu0  ;;  %v2450_v53 = vshrl.u32 %v2449_v43, 7  ;;  %v4106_v43 = vld [vmem:[%s5129_s5 + $0x1c8] sm:$0xff]  }
 0x1e8   :  { %v1908_v56 = vpop.f32.mrb[51].mxu1 }
 0x1f0   :  { %v1965_v57 = vpop.f32.mrb[52].mxu0 }
 0x1f1   :  { %v2006_v58 = vpop.f32.mrb[52].mxu1  ;;  %v2013_v59 = vadd.f32 %v1965_v57, %v1910_v47  ;;  %v1967_v61 = vpop.f32.mrb[53].mxu0 }
 0x1f2   :  { %v2015_v60 = vadd.f32 %v2006_v58, %v1912_v48  ;;  %v2008_v62 = vpop.f32.mrb[53].mxu1  ;;  %v2014_v63 = vadd.f32 %v1967_v61, %v1911_v51  ;;  %v1969_v1 = vpop.f32.mrb[54].mxu0 }
 0x1f3   :  { %v2016_v0 = vadd.f32 %v2008_v62, %v1913_v52  ;;  %v2010_v3 = vpop.f32.mrb[54].mxu1  ;;  %v1970_v4 = vpop.f32.mrb[55].mxu0  ;;  %v2448_v52 = vunpack.c.0.s8 %v2447_v32 }
 0x1f4   :  { %v2011_v5 = vpop.f32.mrb[55].mxu1 }
 0x1f5   :  { %v2451_v3 = vsub.s32 %v2448_v52, %v2450_v53  ;;  %v4114_v52 = vld [vmem:[%s5129_s5 + $0x1d8] sm:$0xff]  }
 0x1fc   :  { %v2068_v6 = vpop.f32.mrb[56].mxu0 }
 0x1fd   :  { %v2109_v7 = vpop.f32.mrb[56].mxu1  ;;  %v2116_v8 = vadd.f32 %v2068_v6, %v2013_v59  ;;  %v2070_v10 = vpop.f32.mrb[57].mxu0 }
 0x1fe   :  { %v2118_v9 = vadd.f32 %v2109_v7, %v2015_v60  ;;  %v2111_v11 = vpop.f32.mrb[57].mxu1  ;;  %v2117_v12 = vadd.f32 %v2070_v10, %v2014_v63  ;;  %v2072_v14 = vpop.f32.mrb[58].mxu0  ;;  %v4174_v10 = vmov 1983009808  }
 0x1ff   :  { %v2119_v13 = vadd.f32 %v2111_v11, %v2016_v0  ;;  %v2113_v15 = vpop.f32.mrb[58].mxu1  ;;  %v2073_v16 = vpop.f32.mrb[59].mxu0  ;;  %v2530_v11 = vunpack.c.l.s4 %v4174_v10  ;;  %v4132_v10 = vld [vmem:[%s5131_s7] sm:$0xff]  }
 0x200   :  { %v2114_v17 = vpop.f32.mrb[59].mxu1 }
 0x208   :  { %v2171_v18 = vpop.f32.mrb[60].mxu0 }
 0x209   :  { %v2212_v20 = vpop.f32.mrb[60].mxu1  ;;  %v2219_v21 = vadd.f32 %v2171_v18, %v2116_v8  ;;  %v2173_v23 = vpop.f32.mrb[61].mxu0 }
 0x20a   :  { %v2221_v22 = vadd.f32 %v2212_v20, %v2118_v9  ;;  %v2214_v24 = vpop.f32.mrb[61].mxu1  ;;  %v2220_v25 = vadd.f32 %v2173_v23, %v2117_v12  ;;  %v2175_v27 = vpop.f32.mrb[62].mxu0  ;;  %v2531_v23 = vunpack.c.0.s8 %v2530_v11  ;;  %v4175_v11 = vmov 0.0  }
 0x20b   :  { %v2222_v26 = vadd.f32 %v2214_v24, %v2119_v13  ;;  %v2216_v28 = vpop.f32.mrb[62].mxu1  ;;  %v2176_v29 = vpop.f32.mrb[63].mxu0 }
 0x20c   :  { %v2217_v30 = vpop.f32.mrb[63].mxu1  ;;  %v2534_v24 = vsub.s32 %v2531_v23, %v2450_v53  ;;  %v4113_v53 = vld [vmem:[%s5129_s5 + $0x118] sm:$0xff]  }
 0x20d   :  { %v4143_v23 = vld [vmem:[%s5133_s9 + $0x18] sm:$0xff]  }
 0x214   :  { %v2274_v31 = vpop.f32.mrb[64].mxu0 }
 0x215   :  { %v2315_v33 = vpop.f32.mrb[64].mxu1  ;;  %v2322_v34 = vadd.f32 %v2274_v31, %v2219_v21  ;;  %v2276_v35 = vpop.f32.mrb[65].mxu0 }
 0x216   :  { %v2324_v19 = vadd.f32 %v2315_v33, %v2221_v22  ;;  %v2317_v36 = vpop.f32.mrb[65].mxu1  ;;  %v2323_v37 = vadd.f32 %v2276_v35, %v2220_v25  ;;  %v2278_v39 = vpop.f32.mrb[66].mxu0 }
 0x217   :  { %v2325_v38 = vadd.f32 %v2317_v36, %v2222_v26  ;;  %v2319_v40 = vpop.f32.mrb[66].mxu1  ;;  %v2279_v41 = vpop.f32.mrb[67].mxu0 }
 0x218   :  { %v2320_v42 = vpop.f32.mrb[67].mxu1  ;;  %v4102_v41 = vld [vmem:[%s5129_s5 + $0x180] sm:$0xff]  }
 0x219   :  { %v4103_v42 = vld [vmem:[%s5129_s5 + $0x148] sm:$0xff]  }
 0x220   :  { %v2377_v45 = vpop.f32.mrb[68].mxu0 }
 0x221   :  { %v2418_v46 = vpop.f32.mrb[68].mxu1  ;;  %v2425_v47 = vadd.f32 %v2377_v45, %v2322_v34  ;;  %v2379_v49 = vpop.f32.mrb[69].mxu0 }
 0x222   :  { %v2427_v48 = vadd.f32 %v2418_v46, %v2324_v19  ;;  %v2420_v50 = vpop.f32.mrb[69].mxu1  ;;  %v2426_v51 = vadd.f32 %v2379_v49, %v2323_v37  ;;  %v2381_v55 = vpop.f32.mrb[70].mxu0  ;;  %v4099_v19 = vld [vmem:[%s5129_s5 + $0x100] sm:$0xff]   ;;  %v4108_v46 = vld [vmem:[%s5129_s5 + $0x150] sm:$0xff]  }
 0x223   :  { %v2428_v54 = vadd.f32 %v2420_v50, %v2325_v38  ;;  %v2422_v56 = vpop.f32.mrb[70].mxu1  ;;  %v2435_v57 = vadd.f32 %v2433_v44, %v2425_v47  ;;  %v2382_v59 = vpop.f32.mrb[71].mxu0  ;;  %v4107_v47 = vld [vmem:[%s5129_s5 + $0x188] sm:$0xff]   ;;  %v4109_v49 = vld [vmem:[%s5129_s5 + $0x110] sm:$0xff]   ;;  %v4112_v50 = vld [vmem:[%s5129_s5 + $0x158] sm:$0xff]  }
 0x224   :  { %v2437_v58 = vadd.f32 %v2433_v44, %v2427_v48  ;;  %v2423_v60 = vpop.f32.mrb[71].mxu1  ;;  %v2436_v61 = vadd.f32 %v2433_v44, %v2426_v51  ;;  %v4110_v48 = vld [vmem:[%s5129_s5 + $0x1d0] sm:$0xff]   ;;  %v4115_v55 = vld [vmem:[%s5129_s5 + $0x198] sm:$0xff]   ;;  %v4118_v56 = vld [vmem:[%s5129_s5 + $0x1e0] sm:$0xff]  }
 0x225   :  { %v2438_v62 = vadd.f32 %v2433_v44, %v2428_v54  ;;  %v2439_v63 = vmax.f32 %v2435_v57, 0.0  ;;  %v4105_v44 = vld [vmem:[%s5129_s5 + $0x108] sm:$0xff]   ;;  %v4111_v51 = vld [vmem:[%s5129_s5 + $0x190] sm:$0xff]   ;;  %v4116_v54 = vld [vmem:[%s5129_s5 + $0x160] sm:$0xff]  }
 0x226   :  { %v2441_v0 = vmax.f32 %v2437_v58, 0.0  ;;  %v2440_v1 = vmax.f32 %v2436_v61, 0.0  ;;  %v4117_v57 = vld [vmem:[%s5129_s5 + $0x120] sm:$0xff]   ;;  %v4120_v58 = vld [vmem:[%s5129_s5 + $0x168] sm:$0xff]  }
 0x227   :  { %v2442_v4 = vmax.f32 %v2438_v62, 0.0  ;;  %v4119_v59 = vld [vmem:[%s5129_s5 + $0x1a0] sm:$0xff]   ;;  %v4122_v60 = vld [vmem:[%s5129_s5 + $0x1e8] sm:$0xff]   ;;  %v4124_v62 = vld [vmem:[%s5129_s5 + $0x170] sm:$0xff]  }
 0x228   :  { %v2445_v5 = vcombine.low %v2439_v63, %v2440_v1  ;;  %v4121_v61 = vld [vmem:[%s5129_s5 + $0x128] sm:$0xff]   ;;  %v4125_v1 = vld [vmem:[%s5129_s5 + $0x130] sm:$0xff]  }
 0x229   :  { %v2468_v6 = vcombine.low %v2441_v0, %v2442_v4  ;;  %v4123_v63 = vld [vmem:[%s5129_s5 + $0x1a8] sm:$0xff]   ;;  %v4126_v0 = vld [vmem:[%s5129_s5 + $0x1f0] sm:$0xff]  }
 0x22a   :  { %v2452_v7 = vrot.slane %v2445_v5, %v2451_v3  ;;  %v4127_v4 = vld [vmem:[%s5129_s5 + $0x1b0] sm:$0xff]   ;;  %v4130_v5 = vld [vmem:[%s5129_s5 + $0x1f8] sm:$0xff]  }
 0x22b   :  { %v2475_v8 = vrot.slane %v2468_v6, %v2451_v3  ;;  %v4129_v6 = vld [vmem:[%s5129_s5 + $0x138] sm:$0xff]  }
 0x22c   :  { %v2459_v12 = vrot.slane %v2452_v7, %v2451_v3  ;;  %v2486_v13 = vcombine.high %v2452_v7, %v2452_v7  ;;  %v4131_v7 = vld [vmem:[%s5129_s5 + $0x1b8] sm:$0xff]  }
 0x22d   :  { %v2482_v14 = vrot.slane %v2475_v8, %v2451_v3  ;;  %v2497_v15 = vcombine.high %v2475_v8, %v2475_v8 }
 0x22e   :  { %2465 = vst.msk [vmem:[#allocation2] ss:$2 sm:$0x3] %vm4915_vm3, %v2459_v12  ;;  %v2493_v16 = vrot.slane %v2486_v13, %v2451_v3  ;;  %v2508_v17 = vcombine.high %v2459_v12, %v2459_v12  ;;  %v4133_v12 = vld [vmem:[%s5131_s7 + $0x8] sm:$0xff]   ;;  %v4134_v13 = vld [vmem:[%s5131_s7 + $0x10] sm:$0xff]  }
 0x22f   :  { %2485 = vst.msk [vmem:[#allocation2 + $0x1] ss:$2 sm:$0x3] %vm4915_vm3, %v2482_v14  ;;  %v2504_v18 = vrot.slane %v2497_v15, %v2451_v3  ;;  %v2512_v20 = vcombine.high %v2482_v14, %v2482_v14  ;;  %v4128_v3 = vld [vmem:[%s5129_s5 + $0x178] sm:$0xff]   ;;  %v4136_v15 = vld [vmem:[%s5131_s7 + $0x20] sm:$0xff]  }
 0x230   :  { %2496 = vst.msk [vmem:[#allocation2 + $0x4] ss:$2 sm:$0x3] %vm4915_vm3, %v2493_v16  ;;  %2511 = vst.msk [vmem:[#allocation2 + $0x8] ss:$2 sm:$0x3] %vm4915_vm3, %v2508_v17  ;;  %v2516_v21 = vcombine.high %v2493_v16, %v2493_v16 }
 0x231   :  { %2507 = vst.msk [vmem:[#allocation2 + $0x5] ss:$2 sm:$0x3] %vm4915_vm3, %v2504_v18  ;;  %2515 = vst.msk [vmem:[#allocation2 + $0x9] ss:$2 sm:$0x3] %vm4915_vm3, %v2512_v20  ;;  %v2520_v22 = vcombine.high %v2504_v18, %v2504_v18 }
 0x232   :  { %2519 = vst.msk [vmem:[#allocation2 + $0xc] ss:$2 sm:$0x3] %vm4915_vm3, %v2516_v21  ;;  %v4135_v14 = vld [vmem:[%s5131_s7 + $0x18] sm:$0xff]   ;;  %v4137_v16 = vld [vmem:[%s5131_s7 + $0x28] sm:$0xff]   ;;  %v4138_v17 = vld [vmem:[%s5131_s7 + $0x30] sm:$0xff]  }
 0x233   :  { %2523 = vst.msk [vmem:[#allocation2 + $0xd] ss:$2 sm:$0x3] %vm4915_vm3, %v2520_v22  ;;  %v4139_v18 = vld [vmem:[%s5131_s7 + $0x38] sm:$0xff]   ;;  %v4140_v20 = vld [vmem:[%s5133_s9] sm:$0xff]   ;;  %v4141_v21 = vld [vmem:[%s5133_s9 + $0x8] sm:$0xff]  }
 0x234   :  { %v4142_v22 = vld [vmem:[%s5133_s9 + $0x10] sm:$0xff]  }
 0x238   :  { %v2524_v25 = vld [vmem:[#allocation2] sm:$0xff] }
 0x239   :  { %v2535_v26 = vrot.slane %v2524_v25, %v2534_v24  ;;  %v2528_v27 = vcombine.high %v2524_v25, %v2524_v25  ;;  %v4145_v25 = vld [vmem:[%s5133_s9 + $0x28] sm:$0xff]  }
 0x23a   :  { %v2525_v28 = vld [vmem:[#allocation2 + $0x8] sm:$0xff] }
 0x23b   :  { %v2543_v29 = vcombine.high %v2535_v26, %v2535_v26  ;;  %v2542_v30 = vrot.slane %v2528_v27, %v2534_v24  ;;  %v4935_v31 = vrot.slane %v2525_v28, %v2534_v24  ;;  %v2545_v33 = vcombine.high %v2525_v28, %v2525_v28  ;;  %v3686_v27 = vld [vmem:[%s5130_s6] ss:$0 sm:$0xff] }
 0x23c   :  { %v2570_v37 = vpack.c.bf16 %v2535_v26, %v2535_v26 }
 0x23d   :  { %v2571_v34 = vpack.c.bf16 %v2543_v29, %v2543_v29  ;;  %v2544_v35 = vcombine.high %v2542_v30, %v2542_v30  ;;  %v2560_v36 = vcombine.high %v4935_v31, %v4935_v31  ;;  %v4942_v38 = vrot.slane %v2545_v33, %v2534_v24  ;;  %v4144_v24 = vld [vmem:[%s5133_s9 + $0x20] sm:$0xff]  }
 0x23e   :  { %v2572_v2 = vpack.c.bf16 %v2542_v30, %v2542_v30  ;;  %v2574_v8 = vpack.c.bf16 %v4935_v31, %v4935_v31 }
 0x23f   :  { %3129 = vmatprep.mubr.bf16.mxu0 %v2571_v34  ;;  %v2573_v39 = vpack.c.bf16 %v2544_v35, %v2544_v35  ;;  %v2575_v40 = vpack.c.bf16 %v2560_v36, %v2560_v36  ;;  %v2561_v32 = vcombine.high %v4942_v38, %v4942_v38  ;;  %v2576_v9 = vpack.c.bf16 %v4942_v38, %v4942_v38 }
 0x240   :  { %3130 = vmatmul.mubr.bf16.vlgmr.msra.gmra.mrb[72].mxu0 %v2570_v37 }
 0x241   :  { %3814 = vmatpush3.bf16.msra.mxu0 %v4099_v19  ;;  %3169 = vmatprep.mubr.bf16.mxu1 %v2573_v39  ;;  %v2577_v45 = vpack.c.bf16 %v2561_v32, %v2561_v32 }
 0x242   :  { %3209 = vmatprep.mubr.bf16.mxu0 %v2575_v40  ;;  %3170 = vmatmul.mubr.bf16.vlgmr.msra.gmra.mrb[72].mxu1 %v2572_v2 }
 0x243   :  { %3836 = vmatpush3.bf16.msra.mxu1 %v4102_v41  ;;  %3815 = vmatprep.subr.bf16.mxu0 %v4103_v42 }
 0x244   :  { %3249 = vmatprep.mubr.bf16.mxu1 %v2577_v45  ;;  %3837 = vmatprep.subr.bf16.mxu1 %v4106_v43 }
 0x245   :  { %3816 = vmatpush3.bf16.msra.mxu0 %v4105_v44 }
 0x246   :  { %3817 = vmatprep.subr.bf16.mxu0 %v4108_v46 }
 0x247   :  { %3838 = vmatpush3.bf16.msra.mxu1 %v4107_v47 }
 0x248   :  { %3839 = vmatprep.subr.bf16.mxu1 %v4110_v48 }
 0x249   :  { %3818 = vmatpush3.bf16.msra.mxu0 %v4109_v49 }
 0x24a   :  { %3819 = vmatprep.subr.bf16.mxu0 %v4112_v50 }
 0x24b   :  { %3840 = vmatpush3.bf16.msra.mxu1 %v4111_v51  ;;  %v4146_v51 = vld [vmem:[%s5133_s9 + $0x30] sm:$0xff]  }
 0x24c   :  { %3841 = vmatprep.subr.bf16.mxu1 %v4114_v52  ;;  %v4147_v52 = vld [vmem:[%s5133_s9 + $0x38] sm:$0xff]  }
 0x24d   :  { %3820 = vmatpush3.bf16.msra.mxu0 %v4113_v53  ;;  %v3751_v53 = vld [vmem:[%s5132_s8] ss:$0 sm:$0xff]  ;;  %s4148_s8 = scalar_lea.vmem %s3491_s28, 32 }
 0x24e   :  { %3821 = vmatprep.subr.bf16.mxu0 %v4116_v54  ;;  %p4149_p0 = scmp.ne.s32.totalorder %s3491_s28, %s4148_s8  ;;  %p4154_p2 = scmp.lt.s32.totalorder %s4148_s8, %s4148_s8 }
 0x24f   :  { %3842 = vmatpush3.bf16.msra.mxu1 %v4115_v55 }
 0x250   :  { %3843 = vmatprep.subr.bf16.mxu1 %v4118_v56  ;;  %p4155_p3 = por %p4154_p2, %p4153_p1 }
 0x251   :  { %3822 = vmatpush3.bf16.msra.mxu0 %v4117_v57 }
 0x252   :  { %3823 = vmatprep.subr.bf16.mxu0 %v4120_v58  ;;  %p4156_p4 = pnand %p4155_p3, %p4149_p0 }
 0x253   :  { %3844 = vmatpush3.bf16.msra.mxu1 %v4119_v59 }
 0x254   :  { %3845 = vmatprep.subr.bf16.mxu1 %v4122_v60 }
 0x255   :  { %3824 = vmatpush3.bf16.msra.mxu0 %v4121_v61  ;;  %v3760_v61 = vld [vmem:[%s5134_s10] ss:$0 sm:$0xff] }
 0x256   :  { %3825 = vmatprep.subr.bf16.mxu0 %v4124_v62 }
 0x257   :  { %3846 = vmatpush3.bf16.msra.mxu1 %v4123_v63 }
 0x258   :  { %3847 = vmatprep.subr.bf16.mxu1 %v4126_v0 }
 0x259   :  { %3826 = vmatpush3.bf16.msra.mxu0 %v4125_v1 }
 0x25a   :  { %3827 = vmatprep.subr.bf16.mxu0 %v4128_v3 }
 0x25b   :  { %3848 = vmatpush3.bf16.msra.mxu1 %v4127_v4 }
 0x25c   :  { %3849 = vmatprep.subr.bf16.mxu1 %v4130_v5 }
 0x25d   :  { %3828 = vmatpush3.bf16.msra.mxu0 %v4129_v6 }
 0x25e   :  { %3875 = vmatprep.subr.bf16.mxu0 %v4175_v11 }
 0x25f   :  { %3850 = vmatpush3.bf16.msra.mxu1 %v4131_v7 }
 0x260   :  { %3210 = vmatmul.mubr.bf16.vlgmr.msra.gmra.mrb[76].mxu0 %v2574_v8  ;;  %3895 = vmatprep.subr.bf16.mxu1 %v4175_v11 }
 0x261   :  { %3876 = vmatpush3.bf16.msra.mxu0 %v4132_v10  ;;  %3891 = vmatprep.mubr.msk.bf16.mxu0 %vm4176_vm4, %v4175_v11 }
 0x262   :  { %3250 = vmatmul.mubr.bf16.vlgmr.msra.gmra.mrb[76].mxu1 %v2576_v9  ;;  %3877 = vmatprep.subr.bf16.mxu0 %v4175_v11 }
 0x263   :  { %3911 = vmatprep.mubr.msk.bf16.mxu1 %vm4176_vm4, %v4175_v11  ;;  %3896 = vmatpush3.bf16.msra.mxu1 %v4140_v20 }
 0x264   :  { %3897 = vmatprep.subr.bf16.mxu1 %v4175_v11 }
 0x265   :  { %3878 = vmatpush3.bf16.msra.mxu0 %v4133_v12 }
 0x266   :  { %3879 = vmatprep.subr.bf16.mxu0 %v4175_v11 }
 0x267   :  { %3898 = vmatpush3.bf16.msra.mxu1 %v4141_v21 }
 0x268   :  { %3899 = vmatprep.subr.bf16.mxu1 %v4175_v11 }
 0x269   :  { %3880 = vmatpush3.bf16.msra.mxu0 %v4134_v13 }
 0x26a   :  { %3881 = vmatprep.subr.bf16.mxu0 %v4175_v11 }
 0x26b   :  { %3900 = vmatpush3.bf16.msra.mxu1 %v4142_v22 }
 0x26c   :  { %3901 = vmatprep.subr.bf16.mxu1 %v4175_v11 }
 0x26d   :  { %3882 = vmatpush3.bf16.msra.mxu0 %v4135_v14 }
 0x26e   :  { %3883 = vmatprep.subr.bf16.mxu0 %v4175_v11 }
 0x26f   :  { %3902 = vmatpush3.bf16.msra.mxu1 %v4143_v23 }
 0x270   :  { %3903 = vmatprep.subr.bf16.mxu1 %v4175_v11 }
 0x271   :  { %3884 = vmatpush3.bf16.msra.mxu0 %v4136_v15 }
 0x272   :  { %3885 = vmatprep.subr.bf16.mxu0 %v4175_v11 }
 0x273   :  { %3904 = vmatpush3.bf16.msra.mxu1 %v4144_v24 }
 0x274   :  { %3905 = vmatprep.subr.bf16.mxu1 %v4175_v11 }
 0x275   :  { %3886 = vmatpush3.bf16.msra.mxu0 %v4137_v16 }
 0x276   :  { %3887 = vmatprep.subr.bf16.mxu0 %v4175_v11 }
 0x277   :  { %3906 = vmatpush3.bf16.msra.mxu1 %v4145_v25 }
 0x278   :  { %3907 = vmatprep.subr.bf16.mxu1 %v4175_v11 }
 0x279   :  { %3888 = vmatpush3.bf16.msra.mxu0 %v4138_v17 }
 0x27a   :  { %3889 = vmatprep.subr.bf16.mxu0 %v4175_v11 }
 0x27b   :  { %3908 = vmatpush3.bf16.msra.mxu1 %v4146_v51 }
 0x27c   :  { %3909 = vmatprep.subr.bf16.mxu1 %v4175_v11 }
 0x27d   :  { %3890 = vmatpush3.bf16.msra.mxu0 %v4139_v18 }
 0x27f   :  { %3910 = vmatpush3.bf16.msra.mxu1 %v4147_v52 }
 0x313   :  { %v3785_v26 = vpop.f32.mrb[72].mxu0 }
 0x314   :  { %v3786_v28 = vpop.f32.mrb[73].mxu0 }
 0x315   :  { %v3787_v29 = vadd.f32 %v3786_v28, %v3785_v26  ;;  %v3788_v30 = vpop.f32.mrb[74].mxu0  ;;  %v3807_v31 = vpop.f32.mrb[72].mxu1 }
 0x316   :  { %v3789_v33 = vpop.f32.mrb[75].mxu0  ;;  %v3808_v34 = vpop.f32.mrb[73].mxu1 }
 0x317   :  { %v3132_v19 = vadd.f32 %v3787_v29, %v3686_v27  ;;  %v3809_v35 = vadd.f32 %v3808_v34, %v3807_v31  ;;  %v3810_v36 = vpop.f32.mrb[74].mxu1 }
 0x318   :  { %v3811_v37 = vpop.f32.mrb[75].mxu1 }
 0x319   :  { %v3172_v38 = vadd.f32 %v3809_v35, %v3132_v19 }
 0x333   :  { %v3829_v39 = vpop.f32.mrb[76].mxu0 }
 0x334   :  { %v3830_v40 = vpop.f32.mrb[77].mxu0 }
 0x335   :  { %v3831_v41 = vadd.f32 %v3830_v40, %v3829_v39  ;;  %v3832_v42 = vpop.f32.mrb[78].mxu0  ;;  %v3851_v2 = vpop.f32.mrb[76].mxu1 }
 0x336   :  { %v3833_v32 = vpop.f32.mrb[79].mxu0  ;;  %v3852_v43 = vpop.f32.mrb[77].mxu1 }
 0x337   :  { %v3212_v44 = vadd.f32 %v3831_v41, %v3172_v38  ;;  %v3853_v45 = vadd.f32 %v3852_v43, %v3851_v2  ;;  %v3854_v46 = vpop.f32.mrb[78].mxu1 }
 0x338   :  { %v3855_v47 = vpop.f32.mrb[79].mxu1 }
 0x339   :  { %v3252_v48 = vadd.f32 %v3853_v45, %v3212_v44 }
 0x33b   :  { %v3257_v49 = vmax.f32 %v3252_v48, 0.0 }
 0x33d   :  { %v3258_v50 = vpack.c.bf16 %v3257_v49, %v3257_v49 }
 0x33f   :  { %3892 = vmatmul.mubr.bf16.vlgmr.msra.gmra.mrb[80].mxu0 %v3258_v50 }
 0x412   :  { %v3364_v54 = vpop.f32.mrb[80].mxu0 }
 0x413   :  { %v3365_v55 = vadd.f32 %v3751_v53, %v3364_v54  ;;  %v3893_v56 = vpop.f32.mrb[81].mxu0 }
 0x414   :  { %v3367_v57 = vpop.f32.mrb[82].mxu0 }
 0x415   :  { %v3370_v58 = vmax.f32 %v3365_v55, 0.0  ;;  %v3894_v59 = vpop.f32.mrb[83].mxu0 }
 0x417   :  { %v3371_v60 = vpack.c.bf16 %v3370_v58, %v3370_v58 }
 0x419   :  { %3912 = vmatmul.mubr.bf16.vlgmr.msra.gmra.mrb[80].mxu1 %v3371_v60 }
 0x4ec   :  { %v3477_v62 = vpop.f32.mrb[80].mxu1 }
 0x4ed   :  { %v3478_v63 = vadd.f32 %v3760_v61, %v3477_v62  ;;  %v3913_v0 = vpop.f32.mrb[81].mxu1 }
 0x4ee   :  { %v3480_v1 = vpop.f32.mrb[82].mxu1 }
 0x4ef   :  { %3483 = vst [vmem:[#allocation3] sm:$0x3] %v3478_v63  ;;  %v3914_v3 = vpop.f32.mrb[83].mxu1 }
 0x4f0   :  { %4159 = shalt.err (!%p4156_p4)
}
 0x4f1   :  { %s4160_s10 = scalar_lea.hbm %s5135_s11, 32 }
 0x4f2   :  { %p4161_p5 = scmp.ne.s32.totalorder %s5135_s11, %s4160_s10  ;;  %p4164_p6 = scmp.lt.u32.totalorder %s4160_s10, %s5135_s11 }
 0x4f4   :  { %p4166_p7 = pnand %p4164_p6, %p4161_p5 }
 0x4f6   :  { %4169 = shalt.err (!%p4166_p7)
}
 0x4f7   :  { %3493 = dma.vmem_to_hbm [thread:$0]  %s3491_s28, 32, %s5135_s11, [#allocation4]  }
 0x4f8   :  { %4170 = dma.done.wait [#allocation4], 32  }
 0x4f9   :  { %4171 = vsyncadd [#allocation4], 4294967264 }
 0x4fa   :  { %3497 = vsyncpa [#allocation4], 1 }

</bundles_post_ra>
